<compile_context>
chip_gen: v7x
topology: tpu7x:2x2x1
jax: 0.10.0
libtpu: 0.0.40
codegen_flags: <defaults>
</compile_context>

<pallas_src>
import functools

import jax
import jax.numpy as jnp
import numpy as np
from jax.experimental import pallas as pl
from jax.experimental.pallas import tpu as pltpu

OUT_PAD = 128   # lane-dense padded width of the per-step logits stream
HIST = 5        # frame_AttAggregate history depth


# ----------------------------------------------------------------------------
# helper: single-shot pallas_call with full-array blocks (SAA/aux head only)
# ----------------------------------------------------------------------------
def _zero_index(nd, i):
    return (0,) * nd


def _pcall(kernel, out_shapes, *args):
    single = not isinstance(out_shapes, (tuple, list))
    outs = (out_shapes,) if single else tuple(out_shapes)
    in_specs = [pl.BlockSpec(a.shape, functools.partial(_zero_index, a.ndim))
                for a in args]
    out_specs = tuple(
        pl.BlockSpec(o.shape, functools.partial(_zero_index, len(o.shape)))
        for o in outs)
    return pl.pallas_call(
        kernel, grid=(1,), in_specs=in_specs,
        out_specs=out_specs[0] if single else out_specs,
        out_shape=outs[0] if single else outs)(*args)


# ----------------------------------------------------------------------------
# Fused per-timestep kernel: phi_x + SpatialAttention + frame_AttAggregate +
# GRU cell + GRUNet dense head.  grid=(T,), state carried in VMEM scratch.
# ----------------------------------------------------------------------------
def _fused_step_kernel(x_ref, z_ref,
                       phi_w_ref, phi_b_ref,
                       att_wa_ref, att_ua_ref, att_ba_ref, att_w_ref,
                       frame_w_ref,
                       w_i_ref, w_h_ref, b_i_ref, b_h_ref,
                       d1_w_ref, d1_b_ref, d2_w_ref, d2_b_ref,
                       out_ref, hid_ref, alpha_ref,
                       h_sc, hist_sc,
                       *, n_obj, h_dim):
    t = pl.program_id(0)
    B = h_sc.shape[0]

    @pl.when(t == 0)
    def _init():
        h_sc[...] = jnp.zeros_like(h_sc)
        hist_sc[...] = jnp.zeros_like(hist_sc)

    # ---- phi_x: one (n_box*B, x_dim) @ (x_dim, h) matmul, weight resident ----
    x_t = x_ref[0].astype(jnp.float32)                       # (n_box*B, x_dim)
    phi = jnp.maximum(
        jnp.dot(x_t, phi_w_ref[...], preferred_element_type=jnp.float32)
        + phi_b_ref[...], 0.0)                               # (n_box*B, h)
    img_embed = phi[0:B, :]                                  # (B, h)   box 0
    obj_all = phi[B:, :]                                     # (n_obj*B, h)

    h_prev = h_sc[...]                                       # (B, h)

    # ---- SpatialAttention: matmuls batched over all objects ----
    hwa = jnp.dot(h_prev, att_wa_ref[...], preferred_element_type=jnp.float32)
    img_part = (jnp.dot(obj_all, att_ua_ref[...],
                        preferred_element_type=jnp.float32) + att_ba_ref[...])
    w_row = att_w_ref[...]                                   # (1, h)
    z_t = z_ref[0].astype(jnp.float32)                       # (B, n_obj)

    scores = []
    for o in range(n_obj):                                   # cheap VPU/EUP work
        e_o = jnp.tanh(img_part[o * B:(o + 1) * B, :] + hwa)            # (B, h)
        scores.append(jnp.sum(e_o * w_row, axis=-1, keepdims=True))     # (B, 1)
    mx = scores[0]
    for o in range(1, n_obj):
        mx = jnp.maximum(mx, scores[o])
    exps = [jnp.exp(s - mx) for s in scores]
    den = exps[0]
    for o in range(1, n_obj):
        den = den + exps[o]
    inv_den = pl.reciprocal(den, approx=True)                # (B, 1)

    a_cols = []
    ctx = jnp.zeros((B, h_dim), jnp.float32)
    for o in range(n_obj):
        a_o = (exps[o] * inv_den) * z_t[:, o:o + 1]          # mask AFTER softmax
        a_cols.append(a_o)
        ctx = ctx + a_o * obj_all[o * B:(o + 1) * B, :]
    alpha_ref[0] = jnp.concatenate(a_cols, axis=1).astype(alpha_ref.dtype)

    # ---- history ring buffer + frame_AttAggregate (t >= 2) ----
    hist_sc[t % HIST] = h_prev                                # pre-GRU hidden

    @pl.when(t >= 2)
    def _frame_agg():
        h_k = [hist_sc[k] for k in range(HIST)]               # each (B, h)
        stacked = jnp.concatenate(h_k, axis=0)                # (HIST*B, h)
        s_all = jnp.dot(jnp.tanh(stacked), frame_w_ref[...],
                        preferred_element_type=jnp.float32)   # one MXU dot
        s_k = [s_all[k * B:(k + 1) * B, :] for k in range(HIST)]
        NEG = jnp.float32(-1e30)
        # slots 0..2 always populated when t >= 2; slot 3 only for t>=3, 4 for t>=4
        v3 = (t >= 3).astype(jnp.float32)
        v4 = (t >= 4).astype(jnp.float32)
        m = jnp.maximum(jnp.maximum(s_k[0], s_k[1]), s_k[2])
        m = jnp.maximum(m, s_k[3] * v3 + (1.0 - v3) * NEG)
        m = jnp.maximum(m, s_k[4] * v4 + (1.0 - v4) * NEG)
        e0 = jnp.exp(s_k[0] - m)
        e1 = jnp.exp(s_k[1] - m)
        e2 = jnp.exp(s_k[2] - m)
        e3 = jnp.exp(s_k[3] - m) * v3
        e4 = jnp.exp(s_k[4] - m) * v4
        inv = pl.reciprocal(e0 + e1 + e2 + e3 + e4, approx=True)
        h_sc[...] = (h_k[0] * e0 + h_k[1] * e1 + h_k[2] * e2
                     + h_k[3] * e3 + h_k[4] * e4) * inv

    h_cur = h_sc[...]

    # ---- GRU cell: gates via two wide matmuls; then dense head ----
    x_cat = jnp.concatenate([ctx, img_embed], axis=-1)        # (B, 2h)
    gi = jnp.dot(x_cat, w_i_ref[...], preferred_element_type=jnp.float32) + b_i_ref[...]
    gh = jnp.dot(h_cur, w_h_ref[...], preferred_element_type=jnp.float32) + b_h_ref[...]
    r = jax.nn.sigmoid(gi[:, 0:h_dim] + gh[:, 0:h_dim])
    zg = jax.nn.sigmoid(gi[:, h_dim:2 * h_dim] + gh[:, h_dim:2 * h_dim])
    n = jnp.tanh(gi[:, 2 * h_dim:3 * h_dim] + r * gh[:, 2 * h_dim:3 * h_dim])
    h_new = (1.0 - zg) * n + zg * h_cur
    h_sc[...] = h_new
    hid_ref[0] = h_new.astype(hid_ref.dtype)

    d1 = jnp.maximum(
        jnp.dot(h_new, d1_w_ref[...], preferred_element_type=jnp.float32)
        + d1_b_ref[...], 0.0)
    out = jnp.dot(d1, d2_w_ref[...], preferred_element_type=jnp.float32) + d2_b_ref[...]
    out_ref[0] = out.astype(out_ref.dtype)                    # (B, OUT_PAD), full-lane store


def _run_time_loop(x_flat_t, z_t, weights, *, B, T, n_obj, n_box, x_dim, h_dim):
    kernel = functools.partial(_fused_step_kernel, n_obj=n_obj, h_dim=h_dim)

    def t_map3(t):
        return (t, 0, 0)

    def w_map(t):                                             # constant -> resident
        return (0, 0)

    in_specs = [pl.BlockSpec((1, n_box * B, x_dim), t_map3),
                pl.BlockSpec((1, B, n_obj), t_map3)]
    in_specs += [pl.BlockSpec(w.shape, w_map) for w in weights]

    out_shape = (jax.ShapeDtypeStruct((T, B, OUT_PAD), jnp.float32),
                 jax.ShapeDtypeStruct((T, B, h_dim), jnp.float32),
                 jax.ShapeDtypeStruct((T, B, n_obj), jnp.float32))
    out_specs = (pl.BlockSpec((1, B, OUT_PAD), t_map3),
                 pl.BlockSpec((1, B, h_dim), t_map3),
                 pl.BlockSpec((1, B, n_obj), t_map3))

    grid_spec = pltpu.PrefetchScalarGridSpec(
        num_scalar_prefetch=0, grid=(T,),
        in_specs=in_specs, out_specs=out_specs,
        scratch_shapes=[pltpu.VMEM((B, h_dim), jnp.float32),
                        pltpu.VMEM((HIST, B, h_dim), jnp.float32)])

    return pl.pallas_call(
        kernel, grid_spec=grid_spec, out_shape=out_shape,
        compiler_params=pltpu.CompilerParams(
            dimension_semantics=("arbitrary",)),
    )(x_flat_t, z_t, *weights)


# ----------------------------------------------------------------------------
# SelfAttAggregate + AccidentPredictor (aux head).  hid: (B, T, h).
# avgpool == maxpool (singleton pooled dim) so the duplicated feature halves
# are folded analytically: energy doubles, dense1 weight halves are summed.
# ----------------------------------------------------------------------------
def _saa_kernel(hid_ref, w_ref, d1_ref, b1_ref, d2_ref, b2_ref, out_ref):
    a = hid_ref[...].astype(jnp.float32)                                  # (B,T,h)
    energy = 2.0 * jnp.einsum("btc,bsc->bts", a, a,
                              preferred_element_type=jnp.float32)         # (B,T,T)
    m = jnp.max(energy, axis=-1, keepdims=True)
    p = jnp.exp(energy - m)
    attn = p * pl.reciprocal(jnp.sum(p, axis=-1, keepdims=True), approx=True)
    weighted = jnp.einsum("bts,bsc->btc", attn, a,
                          preferred_element_type=jnp.float32)             # (B,T,h)
    wcol = w_ref[...][None, :, :]                                         # (1,T,1)
    feat = jnp.sum(weighted * wcol, axis=1)                               # (B,h)
    d1 = jnp.maximum(
        jnp.dot(feat, d1_ref[...], preferred_element_type=jnp.float32)
        + b1_ref[...], 0.0)
    out = jnp.dot(d1, d2_ref[...], preferred_element_type=jnp.float32) + b2_ref[...]
    out_ref[...] = out.astype(out_ref.dtype)


# ----------------------------------------------------------------------------
# Jitted forward core (everything except the data-dependent gap loss)
# ----------------------------------------------------------------------------
@functools.partial(jax.jit, static_argnames=("fps", "lamda"))
def _idsta_core(params, x, y, toa, *, fps, lamda):
    B, T, n_box, x_dim = x.shape
    n_obj = n_box - 1
    h_dim = params["phi_w"].shape[1]

    # zeros_object mask (T, B, n_obj) and per-step flattened boxes (T, n_box*B, x_dim)
    z_t = jnp.transpose(
        (jnp.sum(x[:, :, 1:n_obj + 1, :], axis=3) != 0).astype(jnp.float32),
        (1, 0, 2))
    x_flat_t = jnp.transpose(x, (1, 2, 0, 3)).reshape(T, n_box * B, x_dim)

    # fused / padded weights (all 2-D, lane axis last) -- built once under jit
    w_i = jnp.concatenate([params["w_ir"], params["w_iz"], params["w_in"]], axis=1)
    w_h = jnp.concatenate([params["w_hr"], params["w_hz"], params["w_hn"]], axis=1)
    b_i = jnp.concatenate([params["b_ir"], params["b_iz"], params["b_in"]])[None, :]
    b_h = jnp.concatenate([params["b_hr"], params["b_hz"], params["b_hn"]])[None, :]
    d2_w = jnp.zeros((params["gru_d2_w"].shape[0], OUT_PAD),
                     jnp.float32).at[:, :2].set(params["gru_d2_w"])
    d2_b = jnp.zeros((1, OUT_PAD), jnp.float32).at[0, :2].set(params["gru_d2_b"])
    weights = [
        params["phi_w"], params["phi_b"][None, :],
        params["att_wa"], params["att_ua"], params["att_ba"][None, :],
        params["att_w"].reshape(1, h_dim),
        params["frame_w"],
        w_i, w_h, b_i, b_h,
        params["gru_d1_w"], params["gru_d1_b"][None, :],
        d2_w, d2_b,
    ]

    out_pad, hidden, alphas = _run_time_loop(
        x_flat_t, z_t, weights, B=B, T=T, n_obj=n_obj, n_box=n_box,
        x_dim=x_dim, h_dim=h_dim)
    outputs = out_pad[:, :, :2]                               # (T, B, 2)

    # --- exp-loss summed over time (vectorised over T) ---
    target_cls = y[:, 1].astype(jnp.int32)
    lse = jax.nn.logsumexp(outputs, axis=-1)                  # (T, B)
    sel = jnp.take_along_axis(
        outputs, jnp.broadcast_to(target_cls[None, :, None], (T, B, 1)),
        axis=-1)[..., 0]
    ce = lse - sel                                            # (T, B)
    times = jnp.arange(T, dtype=outputs.dtype)[:, None]       # (T, 1)
    toa_b = toa.astype(outputs.dtype).reshape(B)[None, :]     # (1, B)
    penalty = -jnp.maximum(0.0, (toa_b - times - 1.0) / fps)
    pos_loss = -jnp.exp(penalty) * (-ce)
    per_t = jnp.mean(lamda * pos_loss * y[None, :, 1] + ce * y[None, :, 0], axis=1)
    cross_entropy = jnp.sum(per_t)

    # --- SelfAttAggregate + AccidentPredictor (aux head) ---
    hid_bth = jnp.transpose(hidden, (1, 0, 2))                # (B, T, h)
    d1_w_folded = params["aux_d1_w"][:h_dim] + params["aux_d1_w"][h_dim:]
    dec = _pcall(_saa_kernel, jax.ShapeDtypeStruct((B, 2), jnp.float32),
                 hid_bth, params["saa_w"], d1_w_folded,
                 params["aux_d1_b"][None, :],
                 params["aux_d2_w"], params["aux_d2_b"][None, :])
    aux_ce = (jax.nn.logsumexp(dec, axis=-1)
              - jnp.take_along_axis(dec, target_cls[:, None], axis=-1)[:, 0])
    auxloss = jnp.mean(aux_ce)

    return outputs, hidden, alphas, cross_entropy, dec, auxloss


# ----------------------------------------------------------------------------
# IDSTA forward (eval mode, tpt=0, with_saa=True, with_gap=True)
# ----------------------------------------------------------------------------
def idsta_forward(params, x, y, toa, fps=20.0, lamda=10):
    B, T = x.shape[0], x.shape[1]
    outputs, hidden, alphas, cross_entropy, dec, auxloss = _idsta_core(
        params, x, y, toa, fps=float(fps), lamda=float(lamda))

    losses = {"cross_entropy": cross_entropy, "total_loss": 0.0,
              "auxloss": auxloss, "gaploss": 0.0, "gaploss_frame": 0.0}
    all_outputs = [outputs[t] for t in range(T)]
    all_hidden = [hidden[t] for t in range(T)]
    all_alphas = [alphas[t].T for t in range(T)]              # (n_obj, B) like torch
    mil_outputs = dec

    # --- with_gap: data-dependent shapes / Python int slicing -> kept eager ---
    pos_idx = jnp.where(y[:, 1] > 0)[0]
    has_pos = int(pos_idx.shape[0]) > 0
    has_neg = int(jnp.where(y[:, 0] > 0)[0].shape[0]) > 0
    if has_pos and has_neg:
        samples = outputs                                     # (T, B, 2)
        neg_idx = jnp.where(y[:, 1] == 0)[0]
        positive_samples = jnp.max(samples[:, pos_idx, 1], axis=0)
        negative_samples = jnp.max(samples[:, neg_idx, 1], axis=0)
        n_pos = float(pos_idx.shape[0])
        L5 = jnp.maximum(0.0, 1.0 - jnp.min(positive_samples)
                         + jnp.max(negative_samples)) / n_pos
        L6 = jnp.maximum(0.0, 1.0 - jnp.mean(positive_samples)
                         + jnp.mean(negative_samples)) / n_pos
        losses["gaploss"] = L5 + L6

        accident_samples = samples[:, pos_idx, 1].T           # (n_pos, T)
        L7 = 0.0
        margin = 3
        toa_pos = np.asarray(toa)[np.asarray(pos_idx)].tolist()
        for cur_positive_id, cur_toa in enumerate(toa_pos):
            negative_outputs = accident_samples[cur_positive_id,
                                                0:int(cur_toa[0]) - margin]
            positive_outputs = accident_samples[cur_positive_id,
                                                int(cur_toa[0]) + margin:]
            if negative_outputs.shape[0] == 0 or positive_outputs.shape[0] == 0:
                continue
            L7 = L7 + jnp.maximum(0.0, 1.0 - jnp.max(positive_outputs)
                                  + jnp.max(negative_outputs)) / n_pos
        losses["gaploss_frame"] = L7

    return losses, all_outputs, mil_outputs, all_hidden, all_alphas


# ----------------------------------------------------------------------------
# Deterministic parameter init (synthetic — no checkpoint)
# ----------------------------------------------------------------------------
def init_params(key, x_dim, h_dim, n_frames):
    ks = jax.random.split(key, 24)

    def nrm(k, shape, std):
        return (std * jax.random.normal(k, shape)).astype(jnp.float32)

    in_dim = 2 * h_dim
    p = {
        "phi_w": nrm(ks[0], (x_dim, h_dim), 0.05),
        "phi_b": jnp.zeros((h_dim,), jnp.float32),
        # SpatialAttention
        "att_w": nrm(ks[1], (h_dim, 1), 0.5),
        "att_ua": nrm(ks[2], (h_dim, h_dim), 0.01),
        "att_ba": jnp.zeros((h_dim,), jnp.float32),
        "att_wa": nrm(ks[3], (h_dim, h_dim), 0.01),
        # GRU (PyTorch gate order r, z, n; weights stored transposed)
        "w_ir": nrm(ks[4], (in_dim, h_dim), 0.1),
        "w_iz": nrm(ks[5], (in_dim, h_dim), 0.1),
        "w_in": nrm(ks[6], (in_dim, h_dim), 0.1),
        "w_hr": nrm(ks[7], (h_dim, h_dim), 0.1),
        "w_hz": nrm(ks[8], (h_dim, h_dim), 0.1),
        "w_hn": nrm(ks[9], (h_dim, h_dim), 0.1),
        "b_ir": nrm(ks[10], (h_dim,), 0.05),
        "b_iz": nrm(ks[11], (h_dim,), 0.05),
        "b_in": nrm(ks[12], (h_dim,), 0.05),
        "b_hr": nrm(ks[13], (h_dim,), 0.05),
        "b_hz": nrm(ks[14], (h_dim,), 0.05),
        "b_hn": nrm(ks[15], (h_dim,), 0.05),
        # GRUNet dense head
        "gru_d1_w": nrm(ks[16], (h_dim, 64), 0.1),
        "gru_d1_b": jnp.zeros((64,), jnp.float32),
        "gru_d2_w": nrm(ks[17], (64, 2), 0.1),
        "gru_d2_b": jnp.zeros((2,), jnp.float32),
        # frame_AttAggregate
        # TODO(synk): original hard-codes a (512,512) weight; parameterized as
        # (h_dim, h_dim) so the math is consistent at small synthetic h_dim.
        "frame_w": nrm(ks[18], (h_dim, h_dim), 0.05),
        # SelfAttAggregate (agg_dim = n_frames)
        "saa_w": nrm(ks[19], (n_frames, 1), 0.3),
        # AccidentPredictor (aux)
        "aux_d1_w": nrm(ks[20], (2 * h_dim, 64), 0.1),
        "aux_d1_b": jnp.zeros((64,), jnp.float32),
        "aux_d2_w": nrm(ks[21], (64, 2), 0.1),
        "aux_d2_b": jnp.zeros((2,), jnp.float32),
    }
    return p


# ----------------------------------------------------------------------------
if __name__ == "__main__":
    B, T, n_obj, x_dim, h_dim = 2, 8, 6, 64, 32
    n_box = n_obj + 1

    key = jax.random.PRNGKey(0)
    k_x, k_p = jax.random.split(key)

    x = jax.random.normal(k_x, (B, T, n_box, x_dim), jnp.float32)
    # zero some object boxes so the zeros_object mask is exercised
    x = x.at[0, :, 5:, :].set(0.0)
    y = jnp.array([[1.0, 0.0], [0.0, 1.0]], jnp.float32)      # one neg, one pos
    toa = jnp.array([[float(T + 1)], [4.0]], jnp.float32)      # (B, 1)

    params = init_params(k_p, x_dim, h_dim, T)

    losses, all_outputs, mil_outputs, all_hidden, all_alphas = idsta_forward(
        params, x, y, toa, fps=20.0, lamda=10)

    jax.block_until_ready(losses["cross_entropy"])
    jax.block_until_ready(losses["auxloss"])
    jax.block_until_ready(losses["gaploss"])
    jax.block_until_ready(losses["gaploss_frame"])
    jax.block_until_ready(mil_outputs)
    jax.block_until_ready(all_outputs[-1])
    jax.block_until_ready(all_hidden[-1])
    jax.block_until_ready(all_alphas[-1])
    print("KERNEL_OK")
</pallas_src>

<mosaic_0001>
module attributes {stable_mosaic.version = 11 : i64} {
  func.func @_fused_step_kernel(%arg0: i32, %arg1: memref<1x14x64xf32, #tpu.memory_space<vmem>>, %arg2: memref<1x2x6xf32, #tpu.memory_space<vmem>>, %arg3: memref<64x32xf32, #tpu.memory_space<vmem>>, %arg4: memref<1x32xf32, #tpu.memory_space<vmem>>, %arg5: memref<32x32xf32, #tpu.memory_space<vmem>>, %arg6: memref<32x32xf32, #tpu.memory_space<vmem>>, %arg7: memref<1x32xf32, #tpu.memory_space<vmem>>, %arg8: memref<1x32xf32, #tpu.memory_space<vmem>>, %arg9: memref<32x32xf32, #tpu.memory_space<vmem>>, %arg10: memref<64x96xf32, #tpu.memory_space<vmem>>, %arg11: memref<32x96xf32, #tpu.memory_space<vmem>>, %arg12: memref<1x96xf32, #tpu.memory_space<vmem>>, %arg13: memref<1x96xf32, #tpu.memory_space<vmem>>, %arg14: memref<32x64xf32, #tpu.memory_space<vmem>>, %arg15: memref<1x64xf32, #tpu.memory_space<vmem>>, %arg16: memref<64x128xf32, #tpu.memory_space<vmem>>, %arg17: memref<1x128xf32, #tpu.memory_space<vmem>>, %arg18: memref<1x2x128xf32, #tpu.memory_space<vmem>>, %arg19: memref<1x2x32xf32, #tpu.memory_space<vmem>>, %arg20: memref<1x2x6xf32, #tpu.memory_space<vmem>>, %arg21: memref<2x32xf32, #tpu.memory_space<vmem>>, %arg22: memref<5x2x32xf32, #tpu.memory_space<vmem>>) attributes {dimension_semantics = [#tpu.dimension_semantics<arbitrary>], iteration_bounds = array<i64: 8>, scalar_prefetch = 0 : i64, scratch_operands = 2 : i64, tpu.core_type = #tpu.core_type<tc>, window_params = [{transform_indices = @transform_0, window_bounds = array<i64: 1, 14, 64>}, {transform_indices = @transform_1, window_bounds = array<i64: 1, 2, 6>}, {pipeline_mode = #tpu.pipeline_mode<synchronous>, transform_indices = @transform_2, window_bounds = array<i64: 64, 32>}, {pipeline_mode = #tpu.pipeline_mode<synchronous>, transform_indices = @transform_3, window_bounds = array<i64: 1, 32>}, {pipeline_mode = #tpu.pipeline_mode<synchronous>, transform_indices = @transform_4, window_bounds = array<i64: 32, 32>}, {pipeline_mode = #tpu.pipeline_mode<synchronous>, transform_indices = @transform_5, window_bounds = array<i64: 32, 32>}, {pipeline_mode = #tpu.pipeline_mode<synchronous>, transform_indices = @transform_6, window_bounds = array<i64: 1, 32>}, {pipeline_mode = #tpu.pipeline_mode<synchronous>, transform_indices = @transform_7, window_bounds = array<i64: 1, 32>}, {pipeline_mode = #tpu.pipeline_mode<synchronous>, transform_indices = @transform_8, window_bounds = array<i64: 32, 32>}, {pipeline_mode = #tpu.pipeline_mode<synchronous>, transform_indices = @transform_9, window_bounds = array<i64: 64, 96>}, {pipeline_mode = #tpu.pipeline_mode<synchronous>, transform_indices = @transform_10, window_bounds = array<i64: 32, 96>}, {pipeline_mode = #tpu.pipeline_mode<synchronous>, transform_indices = @transform_11, window_bounds = array<i64: 1, 96>}, {pipeline_mode = #tpu.pipeline_mode<synchronous>, transform_indices = @transform_12, window_bounds = array<i64: 1, 96>}, {pipeline_mode = #tpu.pipeline_mode<synchronous>, transform_indices = @transform_13, window_bounds = array<i64: 32, 64>}, {pipeline_mode = #tpu.pipeline_mode<synchronous>, transform_indices = @transform_14, window_bounds = array<i64: 1, 64>}, {pipeline_mode = #tpu.pipeline_mode<synchronous>, transform_indices = @transform_15, window_bounds = array<i64: 64, 128>}, {pipeline_mode = #tpu.pipeline_mode<synchronous>, transform_indices = @transform_16, window_bounds = array<i64: 1, 128>}, {transform_indices = @transform_17, window_bounds = array<i64: 1, 2, 128>}, {transform_indices = @transform_18, window_bounds = array<i64: 1, 2, 32>}, {transform_indices = @transform_19, window_bounds = array<i64: 1, 2, 6>}]} {
    %c0_i32 = arith.constant 0 : i32
    %0 = arith.cmpi eq, %arg0, %c0_i32 : i32
    %1 = arith.extui %0 : i1 to i32
    %c0_i32_0 = arith.constant 0 : i32
    %2 = arith.cmpi ne, %1, %c0_i32_0 : i32
    scf.if %2 {
      %cst_74 = arith.constant 0.000000e+00 : f32
      %211 = vector.broadcast %cst_74 : f32 to vector<2x32xf32>
      %c0_75 = arith.constant 0 : index
      %c0_76 = arith.constant 0 : index
      %212 = vector.load %arg21[%c0_75, %c0_76] : memref<2x32xf32, #tpu.memory_space<vmem>>, vector<2x32xf32>
      tpu.vector_store %arg21[%c0_75, %c0_76], %211 {strides = array<i32>} : memref<2x32xf32, #tpu.memory_space<vmem>>, vector<2x32xf32>,
      %cst_77 = arith.constant 0.000000e+00 : f32
      %213 = vector.broadcast %cst_77 : f32 to vector<5x2x32xf32>
      %c0_78 = arith.constant 0 : index
      %c0_79 = arith.constant 0 : index
      %c0_80 = arith.constant 0 : index
      %214 = vector.load %arg22[%c0_78, %c0_79, %c0_80] : memref<5x2x32xf32, #tpu.memory_space<vmem>>, vector<5x2x32xf32>
      tpu.vector_store %arg22[%c0_78, %c0_79, %c0_80], %213 {strides = array<i32>} : memref<5x2x32xf32, #tpu.memory_space<vmem>>, vector<5x2x32xf32>,
    } else {
    }
    %c0 = arith.constant 0 : index
    %c0_1 = arith.constant 0 : index
    %c0_2 = arith.constant 0 : index
    %3 = vector.load %arg1[%c0, %c0_1, %c0_2] : memref<1x14x64xf32, #tpu.memory_space<vmem>>, vector<1x14x64xf32>
    %4 = vector.shape_cast %3 : vector<1x14x64xf32> to vector<14x64xf32>
    %c0_3 = arith.constant 0 : index
    %c0_4 = arith.constant 0 : index
    %5 = vector.load %arg3[%c0_3, %c0_4] : memref<64x32xf32, #tpu.memory_space<vmem>>, vector<64x32xf32>
    %cst = arith.constant dense<0.000000e+00> : vector<14x32xf32>
    %6 = tpu.matmul %4, %5, %cst {dimension_numbers = #tpu.dot_dimension_numbers<[1], [0], [0], [1], [0, 0, 1, 1], [], []>} : vector<14x64xf32>, vector<64x32xf32>, vector<14x32xf32> -> vector<14x32xf32>
    %c0_5 = arith.constant 0 : index
    %c0_6 = arith.constant 0 : index
    %7 = vector.load %arg4[%c0_5, %c0_6] : memref<1x32xf32, #tpu.memory_space<vmem>>, vector<1x32xf32>
    %8 = vector.broadcast %7 : vector<1x32xf32> to vector<14x32xf32>
    %9 = arith.addf %6, %8 : vector<14x32xf32>
    %cst_7 = arith.constant 0.000000e+00 : f32
    %10 = vector.broadcast %cst_7 : f32 to vector<14x32xf32>
    %11 = arith.maximumf %9, %10 : vector<14x32xf32>
    %12 = vector.extract_strided_slice %11 {offsets = [0, 0], sizes = [2, 32], strides = [1, 1]} : vector<14x32xf32> to vector<2x32xf32>
    %13 = vector.extract_strided_slice %11 {offsets = [2, 0], sizes = [12, 32], strides = [1, 1]} : vector<14x32xf32> to vector<12x32xf32>
    %c0_8 = arith.constant 0 : index
    %c0_9 = arith.constant 0 : index
    %14 = vector.load %arg21[%c0_8, %c0_9] : memref<2x32xf32, #tpu.memory_space<vmem>>, vector<2x32xf32>
    %c0_10 = arith.constant 0 : index
    %c0_11 = arith.constant 0 : index
    %15 = vector.load %arg5[%c0_10, %c0_11] : memref<32x32xf32, #tpu.memory_space<vmem>>, vector<32x32xf32>
    %cst_12 = arith.constant dense<0.000000e+00> : vector<2x32xf32>
    %16 = tpu.matmul %14, %15, %cst_12 {dimension_numbers = #tpu.dot_dimension_numbers<[1], [0], [0], [1], [0, 0, 1, 1], [], []>} : vector<2x32xf32>, vector<32x32xf32>, vector<2x32xf32> -> vector<2x32xf32>
    %c0_13 = arith.constant 0 : index
    %c0_14 = arith.constant 0 : index
    %17 = vector.load %arg6[%c0_13, %c0_14] : memref<32x32xf32, #tpu.memory_space<vmem>>, vector<32x32xf32>
    %cst_15 = arith.constant dense<0.000000e+00> : vector<12x32xf32>
    %18 = tpu.matmul %13, %17, %cst_15 {dimension_numbers = #tpu.dot_dimension_numbers<[1], [0], [0], [1], [0, 0, 1, 1], [], []>} : vector<12x32xf32>, vector<32x32xf32>, vector<12x32xf32> -> vector<12x32xf32>
    %c0_16 = arith.constant 0 : index
    %c0_17 = arith.constant 0 : index
    %19 = vector.load %arg7[%c0_16, %c0_17] : memref<1x32xf32, #tpu.memory_space<vmem>>, vector<1x32xf32>
    %20 = vector.broadcast %19 : vector<1x32xf32> to vector<12x32xf32>
    %21 = arith.addf %18, %20 : vector<12x32xf32>
    %c0_18 = arith.constant 0 : index
    %c0_19 = arith.constant 0 : index
    %22 = vector.load %arg8[%c0_18, %c0_19] : memref<1x32xf32, #tpu.memory_space<vmem>>, vector<1x32xf32>
    %c0_20 = arith.constant 0 : index
    %c0_21 = arith.constant 0 : index
    %c0_22 = arith.constant 0 : index
    %23 = vector.load %arg2[%c0_20, %c0_21, %c0_22] : memref<1x2x6xf32, #tpu.memory_space<vmem>>, vector<1x2x6xf32>
    %24 = vector.shape_cast %23 : vector<1x2x6xf32> to vector<2x6xf32>
    %25 = vector.extract_strided_slice %21 {offsets = [0, 0], sizes = [2, 32], strides = [1, 1]} : vector<12x32xf32> to vector<2x32xf32>
    %26 = arith.addf %25, %16 : vector<2x32xf32>
    %27 = math.tanh %26 : vector<2x32xf32>
    %28 = vector.broadcast %22 : vector<1x32xf32> to vector<2x32xf32>
    %29 = arith.mulf %27, %28 : vector<2x32xf32>
    %cst_23 = arith.constant dense<0.000000e+00> : vector<2xf32>
    %30 = vector.multi_reduction <add>, %29, %cst_23 [1] : vector<2x32xf32> to vector<2xf32>
    %31 = vector.shape_cast %30 : vector<2xf32> to vector<2x1xf32>
    %32 = vector.extract_strided_slice %21 {offsets = [2, 0], sizes = [2, 32], strides = [1, 1]} : vector<12x32xf32> to vector<2x32xf32>
    %33 = arith.addf %32, %16 : vector<2x32xf32>
    %34 = math.tanh %33 : vector<2x32xf32>
    %35 = vector.broadcast %22 : vector<1x32xf32> to vector<2x32xf32>
    %36 = arith.mulf %34, %35 : vector<2x32xf32>
    %cst_24 = arith.constant dense<0.000000e+00> : vector<2xf32>
    %37 = vector.multi_reduction <add>, %36, %cst_24 [1] : vector<2x32xf32> to vector<2xf32>
    %38 = vector.shape_cast %37 : vector<2xf32> to vector<2x1xf32>
    %39 = vector.extract_strided_slice %21 {offsets = [4, 0], sizes = [2, 32], strides = [1, 1]} : vector<12x32xf32> to vector<2x32xf32>
    %40 = arith.addf %39, %16 : vector<2x32xf32>
    %41 = math.tanh %40 : vector<2x32xf32>
    %42 = vector.broadcast %22 : vector<1x32xf32> to vector<2x32xf32>
    %43 = arith.mulf %41, %42 : vector<2x32xf32>
    %cst_25 = arith.constant dense<0.000000e+00> : vector<2xf32>
    %44 = vector.multi_reduction <add>, %43, %cst_25 [1] : vector<2x32xf32> to vector<2xf32>
    %45 = vector.shape_cast %44 : vector<2xf32> to vector<2x1xf32>
    %46 = vector.extract_strided_slice %21 {offsets = [6, 0], sizes = [2, 32], strides = [1, 1]} : vector<12x32xf32> to vector<2x32xf32>
    %47 = arith.addf %46, %16 : vector<2x32xf32>
    %48 = math.tanh %47 : vector<2x32xf32>
    %49 = vector.broadcast %22 : vector<1x32xf32> to vector<2x32xf32>
    %50 = arith.mulf %48, %49 : vector<2x32xf32>
    %cst_26 = arith.constant dense<0.000000e+00> : vector<2xf32>
    %51 = vector.multi_reduction <add>, %50, %cst_26 [1] : vector<2x32xf32> to vector<2xf32>
    %52 = vector.shape_cast %51 : vector<2xf32> to vector<2x1xf32>
    %53 = vector.extract_strided_slice %21 {offsets = [8, 0], sizes = [2, 32], strides = [1, 1]} : vector<12x32xf32> to vector<2x32xf32>
    %54 = arith.addf %53, %16 : vector<2x32xf32>
    %55 = math.tanh %54 : vector<2x32xf32>
    %56 = vector.broadcast %22 : vector<1x32xf32> to vector<2x32xf32>
    %57 = arith.mulf %55, %56 : vector<2x32xf32>
    %cst_27 = arith.constant dense<0.000000e+00> : vector<2xf32>
    %58 = vector.multi_reduction <add>, %57, %cst_27 [1] : vector<2x32xf32> to vector<2xf32>
    %59 = vector.shape_cast %58 : vector<2xf32> to vector<2x1xf32>
    %60 = vector.extract_strided_slice %21 {offsets = [10, 0], sizes = [2, 32], strides = [1, 1]} : vector<12x32xf32> to vector<2x32xf32>
    %61 = arith.addf %60, %16 : vector<2x32xf32>
    %62 = math.tanh %61 : vector<2x32xf32>
    %63 = vector.broadcast %22 : vector<1x32xf32> to vector<2x32xf32>
    %64 = arith.mulf %62, %63 : vector<2x32xf32>
    %cst_28 = arith.constant dense<0.000000e+00> : vector<2xf32>
    %65 = vector.multi_reduction <add>, %64, %cst_28 [1] : vector<2x32xf32> to vector<2xf32>
    %66 = vector.shape_cast %65 : vector<2xf32> to vector<2x1xf32>
    %67 = arith.maximumf %31, %38 : vector<2x1xf32>
    %68 = arith.maximumf %67, %45 : vector<2x1xf32>
    %69 = arith.maximumf %68, %52 : vector<2x1xf32>
    %70 = arith.maximumf %69, %59 : vector<2x1xf32>
    %71 = arith.maximumf %70, %66 : vector<2x1xf32>
    %72 = arith.subf %31, %71 : vector<2x1xf32>
    %73 = math.exp %72 : vector<2x1xf32>
    %74 = arith.subf %38, %71 : vector<2x1xf32>
    %75 = math.exp %74 : vector<2x1xf32>
    %76 = arith.subf %45, %71 : vector<2x1xf32>
    %77 = math.exp %76 : vector<2x1xf32>
    %78 = arith.subf %52, %71 : vector<2x1xf32>
    %79 = math.exp %78 : vector<2x1xf32>
    %80 = arith.subf %59, %71 : vector<2x1xf32>
    %81 = math.exp %80 : vector<2x1xf32>
    %82 = arith.subf %66, %71 : vector<2x1xf32>
    %83 = math.exp %82 : vector<2x1xf32>
    %84 = arith.addf %73, %75 : vector<2x1xf32>
    %85 = arith.addf %84, %77 : vector<2x1xf32>
    %86 = arith.addf %85, %79 : vector<2x1xf32>
    %87 = arith.addf %86, %81 : vector<2x1xf32>
    %88 = arith.addf %87, %83 : vector<2x1xf32>
    %89 = tpu.reciprocal %88 {approx = true} : vector<2x1xf32> -> vector<2x1xf32>
    %cst_29 = arith.constant 0.000000e+00 : f32
    %90 = vector.broadcast %cst_29 : f32 to vector<2x32xf32>
    %91 = arith.mulf %73, %89 : vector<2x1xf32>
    %92 = vector.extract_strided_slice %24 {offsets = [0, 0], sizes = [2, 1], strides = [1, 1]} : vector<2x6xf32> to vector<2x1xf32>
    %93 = arith.mulf %91, %92 : vector<2x1xf32>
    %94 = vector.extract_strided_slice %13 {offsets = [0, 0], sizes = [2, 32], strides = [1, 1]} : vector<12x32xf32> to vector<2x32xf32>
    %95 = vector.broadcast %93 : vector<2x1xf32> to vector<2x32xf32>
    %96 = arith.mulf %95, %94 : vector<2x32xf32>
    %97 = arith.addf %90, %96 : vector<2x32xf32>
    %98 = arith.mulf %75, %89 : vector<2x1xf32>
    %99 = vector.extract_strided_slice %24 {offsets = [0, 1], sizes = [2, 1], strides = [1, 1]} : vector<2x6xf32> to vector<2x1xf32>
    %100 = arith.mulf %98, %99 : vector<2x1xf32>
    %101 = vector.extract_strided_slice %13 {offsets = [2, 0], sizes = [2, 32], strides = [1, 1]} : vector<12x32xf32> to vector<2x32xf32>
    %102 = vector.broadcast %100 : vector<2x1xf32> to vector<2x32xf32>
    %103 = arith.mulf %102, %101 : vector<2x32xf32>
    %104 = arith.addf %97, %103 : vector<2x32xf32>
    %105 = arith.mulf %77, %89 : vector<2x1xf32>
    %106 = vector.extract_strided_slice %24 {offsets = [0, 2], sizes = [2, 1], strides = [1, 1]} : vector<2x6xf32> to vector<2x1xf32>
    %107 = arith.mulf %105, %106 : vector<2x1xf32>
    %108 = vector.extract_strided_slice %13 {offsets = [4, 0], sizes = [2, 32], strides = [1, 1]} : vector<12x32xf32> to vector<2x32xf32>
    %109 = vector.broadcast %107 : vector<2x1xf32> to vector<2x32xf32>
    %110 = arith.mulf %109, %108 : vector<2x32xf32>
    %111 = arith.addf %104, %110 : vector<2x32xf32>
    %112 = arith.mulf %79, %89 : vector<2x1xf32>
    %113 = vector.extract_strided_slice %24 {offsets = [0, 3], sizes = [2, 1], strides = [1, 1]} : vector<2x6xf32> to vector<2x1xf32>
    %114 = arith.mulf %112, %113 : vector<2x1xf32>
    %115 = vector.extract_strided_slice %13 {offsets = [6, 0], sizes = [2, 32], strides = [1, 1]} : vector<12x32xf32> to vector<2x32xf32>
    %116 = vector.broadcast %114 : vector<2x1xf32> to vector<2x32xf32>
    %117 = arith.mulf %116, %115 : vector<2x32xf32>
    %118 = arith.addf %111, %117 : vector<2x32xf32>
    %119 = arith.mulf %81, %89 : vector<2x1xf32>
    %120 = vector.extract_strided_slice %24 {offsets = [0, 4], sizes = [2, 1], strides = [1, 1]} : vector<2x6xf32> to vector<2x1xf32>
    %121 = arith.mulf %119, %120 : vector<2x1xf32>
    %122 = vector.extract_strided_slice %13 {offsets = [8, 0], sizes = [2, 32], strides = [1, 1]} : vector<12x32xf32> to vector<2x32xf32>
    %123 = vector.broadcast %121 : vector<2x1xf32> to vector<2x32xf32>
    %124 = arith.mulf %123, %122 : vector<2x32xf32>
    %125 = arith.addf %118, %124 : vector<2x32xf32>
    %126 = arith.mulf %83, %89 : vector<2x1xf32>
    %127 = vector.extract_strided_slice %24 {offsets = [0, 5], sizes = [2, 1], strides = [1, 1]} : vector<2x6xf32> to vector<2x1xf32>
    %128 = arith.mulf %126, %127 : vector<2x1xf32>
    %129 = vector.extract_strided_slice %13 {offsets = [10, 0], sizes = [2, 32], strides = [1, 1]} : vector<12x32xf32> to vector<2x32xf32>
    %130 = vector.broadcast %128 : vector<2x1xf32> to vector<2x32xf32>
    %131 = arith.mulf %130, %129 : vector<2x32xf32>
    %132 = arith.addf %125, %131 : vector<2x32xf32>
    %133 = tpu.concatenate %93, %100, %107, %114, %121, %128 in 1 : vector<2x1xf32>, vector<2x1xf32>, vector<2x1xf32>, vector<2x1xf32>, vector<2x1xf32>, vector<2x1xf32> -> vector<2x6xf32>
    %c0_30 = arith.constant 0 : index
    %c0_31 = arith.constant 0 : index
    %c0_32 = arith.constant 0 : index
    %134 = vector.load %arg20[%c0_30, %c0_31, %c0_32] : memref<1x2x6xf32, #tpu.memory_space<vmem>>, vector<1x2x6xf32>
    %135 = vector.shape_cast %134 : vector<1x2x6xf32> to vector<2x6xf32>
    %136 = vector.shape_cast %133 : vector<2x6xf32> to vector<1x2x6xf32>
    tpu.vector_store %arg20[%c0_30, %c0_31, %c0_32], %136 {strides = array<i32>} : memref<1x2x6xf32, #tpu.memory_space<vmem>>, vector<1x2x6xf32>,
    %c5_i32 = arith.constant 5 : i32
    %c0_i32_33 = arith.constant 0 : i32
    %137 = arith.cmpi eq, %c5_i32, %c0_i32_33 : i32
    %c1_i32 = arith.constant 1 : i32
    %138 = arith.select %137, %c1_i32, %c5_i32 : i32
    %139 = arith.remsi %arg0, %138 : i32
    %c0_i32_34 = arith.constant 0 : i32
    %140 = arith.cmpi ne, %139, %c0_i32_34 : i32
    %c0_i32_35 = arith.constant 0 : i32
    %141 = arith.cmpi slt, %139, %c0_i32_35 : i32
    %c0_i32_36 = arith.constant 0 : i32
    %142 = arith.cmpi slt, %138, %c0_i32_36 : i32
    %143 = arith.xori %141, %142 : i1
    %144 = arith.andi %143, %140 : i1
    %145 = arith.addi %139, %138 : i32
    %146 = arith.select %144, %145, %139 : i32
    %147 = arith.index_cast %146 : i32 to index
    %c0_37 = arith.constant 0 : index
    %c0_38 = arith.constant 0 : index
    %148 = vector.load %arg22[%147, %c0_37, %c0_38] : memref<5x2x32xf32, #tpu.memory_space<vmem>>, vector<1x2x32xf32>
    %149 = vector.shape_cast %148 : vector<1x2x32xf32> to vector<2x32xf32>
    %150 = vector.shape_cast %14 : vector<2x32xf32> to vector<1x2x32xf32>
    tpu.vector_store %arg22[%147, %c0_37, %c0_38], %150 {strides = array<i32>} : memref<5x2x32xf32, #tpu.memory_space<vmem>>, vector<1x2x32xf32>,
    %c2_i32 = arith.constant 2 : i32
    %151 = arith.cmpi sge, %arg0, %c2_i32 : i32
    %152 = arith.extui %151 : i1 to i32
    %c0_i32_39 = arith.constant 0 : i32
    %153 = arith.cmpi ne, %152, %c0_i32_39 : i32
    scf.if %153 {
      %c0_74 = arith.constant 0 : index
      %c0_75 = arith.constant 0 : index
      %c0_76 = arith.constant 0 : index
      %211 = vector.load %arg22[%c0_74, %c0_75, %c0_76] : memref<5x2x32xf32, #tpu.memory_space<vmem>>, vector<1x2x32xf32>
      %212 = vector.shape_cast %211 : vector<1x2x32xf32> to vector<2x32xf32>
      %c1 = arith.constant 1 : index
      %c0_77 = arith.constant 0 : index
      %c0_78 = arith.constant 0 : index
      %213 = vector.load %arg22[%c1, %c0_77, %c0_78] : memref<5x2x32xf32, #tpu.memory_space<vmem>>, vector<1x2x32xf32>
      %214 = vector.shape_cast %213 : vector<1x2x32xf32> to vector<2x32xf32>
      %c2 = arith.constant 2 : index
      %c0_79 = arith.constant 0 : index
      %c0_80 = arith.constant 0 : index
      %215 = vector.load %arg22[%c2, %c0_79, %c0_80] : memref<5x2x32xf32, #tpu.memory_space<vmem>>, vector<1x2x32xf32>
      %216 = vector.shape_cast %215 : vector<1x2x32xf32> to vector<2x32xf32>
      %c3 = arith.constant 3 : index
      %c0_81 = arith.constant 0 : index
      %c0_82 = arith.constant 0 : index
      %217 = vector.load %arg22[%c3, %c0_81, %c0_82] : memref<5x2x32xf32, #tpu.memory_space<vmem>>, vector<1x2x32xf32>
      %218 = vector.shape_cast %217 : vector<1x2x32xf32> to vector<2x32xf32>
      %c4 = arith.constant 4 : index
      %c0_83 = arith.constant 0 : index
      %c0_84 = arith.constant 0 : index
      %219 = vector.load %arg22[%c4, %c0_83, %c0_84] : memref<5x2x32xf32, #tpu.memory_space<vmem>>, vector<1x2x32xf32>
      %220 = vector.shape_cast %219 : vector<1x2x32xf32> to vector<2x32xf32>
      %221 = tpu.concatenate %212, %214, %216, %218, %220 in 0 : vector<2x32xf32>, vector<2x32xf32>, vector<2x32xf32>, vector<2x32xf32>, vector<2x32xf32> -> vector<10x32xf32>
      %222 = math.tanh %221 : vector<10x32xf32>
      %c0_85 = arith.constant 0 : index
      %c0_86 = arith.constant 0 : index
      %223 = vector.load %arg9[%c0_85, %c0_86] : memref<32x32xf32, #tpu.memory_space<vmem>>, vector<32x32xf32>
      %cst_87 = arith.constant dense<0.000000e+00> : vector<10x32xf32>
      %224 = tpu.matmul %222, %223, %cst_87 {dimension_numbers = #tpu.dot_dimension_numbers<[1], [0], [0], [1], [0, 0, 1, 1], [], []>} : vector<10x32xf32>, vector<32x32xf32>, vector<10x32xf32> -> vector<10x32xf32>
      %225 = vector.extract_strided_slice %224 {offsets = [0, 0], sizes = [2, 32], strides = [1, 1]} : vector<10x32xf32> to vector<2x32xf32>
      %226 = vector.extract_strided_slice %224 {offsets = [2, 0], sizes = [2, 32], strides = [1, 1]} : vector<10x32xf32> to vector<2x32xf32>
      %227 = vector.extract_strided_slice %224 {offsets = [4, 0], sizes = [2, 32], strides = [1, 1]} : vector<10x32xf32> to vector<2x32xf32>
      %228 = vector.extract_strided_slice %224 {offsets = [6, 0], sizes = [2, 32], strides = [1, 1]} : vector<10x32xf32> to vector<2x32xf32>
      %229 = vector.extract_strided_slice %224 {offsets = [8, 0], sizes = [2, 32], strides = [1, 1]} : vector<10x32xf32> to vector<2x32xf32>
      %c3_i32 = arith.constant 3 : i32
      %230 = arith.cmpi sge, %arg0, %c3_i32 : i32
      %231 = arith.extui %230 : i1 to i32
      %232 = arith.sitofp %231 : i32 to f32
      %c4_i32 = arith.constant 4 : i32
      %233 = arith.cmpi sge, %arg0, %c4_i32 : i32
      %234 = arith.extui %233 : i1 to i32
      %235 = arith.sitofp %234 : i32 to f32
      %236 = arith.maximumf %225, %226 : vector<2x32xf32>
      %237 = arith.maximumf %236, %227 : vector<2x32xf32>
      %238 = vector.broadcast %232 : f32 to vector<2x32xf32>
      %239 = arith.mulf %228, %238 : vector<2x32xf32>
      %cst_88 = arith.constant 1.000000e+00 : f32
      %240 = arith.subf %cst_88, %232 : f32
      %cst_89 = arith.constant -1.000000e+30 : f32
      %241 = arith.mulf %240, %cst_89 : f32
      %242 = vector.broadcast %241 : f32 to vector<2x32xf32>
      %243 = arith.addf %239, %242 : vector<2x32xf32>
      %244 = arith.maximumf %237, %243 : vector<2x32xf32>
      %245 = vector.broadcast %235 : f32 to vector<2x32xf32>
      %246 = arith.mulf %229, %245 : vector<2x32xf32>
      %cst_90 = arith.constant 1.000000e+00 : f32
      %247 = arith.subf %cst_90, %235 : f32
      %cst_91 = arith.constant -1.000000e+30 : f32
      %248 = arith.mulf %247, %cst_91 : f32
      %249 = vector.broadcast %248 : f32 to vector<2x32xf32>
      %250 = arith.addf %246, %249 : vector<2x32xf32>
      %251 = arith.maximumf %244, %250 : vector<2x32xf32>
      %252 = arith.subf %225, %251 : vector<2x32xf32>
      %253 = math.exp %252 : vector<2x32xf32>
      %254 = arith.subf %226, %251 : vector<2x32xf32>
      %255 = math.exp %254 : vector<2x32xf32>
      %256 = arith.subf %227, %251 : vector<2x32xf32>
      %257 = math.exp %256 : vector<2x32xf32>
      %258 = arith.subf %228, %251 : vector<2x32xf32>
      %259 = math.exp %258 : vector<2x32xf32>
      %260 = vector.broadcast %232 : f32 to vector<2x32xf32>
      %261 = arith.mulf %259, %260 : vector<2x32xf32>
      %262 = arith.subf %229, %251 : vector<2x32xf32>
      %263 = math.exp %262 : vector<2x32xf32>
      %264 = vector.broadcast %235 : f32 to vector<2x32xf32>
      %265 = arith.mulf %263, %264 : vector<2x32xf32>
      %266 = arith.addf %253, %255 : vector<2x32xf32>
      %267 = arith.addf %266, %257 : vector<2x32xf32>
      %268 = arith.addf %267, %261 : vector<2x32xf32>
      %269 = arith.addf %268, %265 : vector<2x32xf32>
      %270 = tpu.reciprocal %269 {approx = true} : vector<2x32xf32> -> vector<2x32xf32>
      %271 = arith.mulf %212, %253 : vector<2x32xf32>
      %272 = arith.mulf %214, %255 : vector<2x32xf32>
      %273 = arith.addf %271, %272 : vector<2x32xf32>
      %274 = arith.mulf %216, %257 : vector<2x32xf32>
      %275 = arith.addf %273, %274 : vector<2x32xf32>
      %276 = arith.mulf %218, %261 : vector<2x32xf32>
      %277 = arith.addf %275, %276 : vector<2x32xf32>
      %278 = arith.mulf %220, %265 : vector<2x32xf32>
      %279 = arith.addf %277, %278 : vector<2x32xf32>
      %280 = arith.mulf %279, %270 : vector<2x32xf32>
      %c0_92 = arith.constant 0 : index
      %c0_93 = arith.constant 0 : index
      %281 = vector.load %arg21[%c0_92, %c0_93] : memref<2x32xf32, #tpu.memory_space<vmem>>, vector<2x32xf32>
      tpu.vector_store %arg21[%c0_92, %c0_93], %280 {strides = array<i32>} : memref<2x32xf32, #tpu.memory_space<vmem>>, vector<2x32xf32>,
    } else {
    }
    %c0_40 = arith.constant 0 : index
    %c0_41 = arith.constant 0 : index
    %154 = vector.load %arg21[%c0_40, %c0_41] : memref<2x32xf32, #tpu.memory_space<vmem>>, vector<2x32xf32>
    %155 = tpu.concatenate %132, %12 in 1 : vector<2x32xf32>, vector<2x32xf32> -> vector<2x64xf32>
    %c0_42 = arith.constant 0 : index
    %c0_43 = arith.constant 0 : index
    %156 = vector.load %arg10[%c0_42, %c0_43] : memref<64x96xf32, #tpu.memory_space<vmem>>, vector<64x96xf32>
    %cst_44 = arith.constant dense<0.000000e+00> : vector<2x96xf32>
    %157 = tpu.matmul %155, %156, %cst_44 {dimension_numbers = #tpu.dot_dimension_numbers<[1], [0], [0], [1], [0, 0, 1, 1], [], []>} : vector<2x64xf32>, vector<64x96xf32>, vector<2x96xf32> -> vector<2x96xf32>
    %c0_45 = arith.constant 0 : index
    %c0_46 = arith.constant 0 : index
    %158 = vector.load %arg12[%c0_45, %c0_46] : memref<1x96xf32, #tpu.memory_space<vmem>>, vector<1x96xf32>
    %159 = vector.broadcast %158 : vector<1x96xf32> to vector<2x96xf32>
    %160 = arith.addf %157, %159 : vector<2x96xf32>
    %c0_47 = arith.constant 0 : index
    %c0_48 = arith.constant 0 : index
    %161 = vector.load %arg11[%c0_47, %c0_48] : memref<32x96xf32, #tpu.memory_space<vmem>>, vector<32x96xf32>
    %cst_49 = arith.constant dense<0.000000e+00> : vector<2x96xf32>
    %162 = tpu.matmul %154, %161, %cst_49 {dimension_numbers = #tpu.dot_dimension_numbers<[1], [0], [0], [1], [0, 0, 1, 1], [], []>} : vector<2x32xf32>, vector<32x96xf32>, vector<2x96xf32> -> vector<2x96xf32>
    %c0_50 = arith.constant 0 : index
    %c0_51 = arith.constant 0 : index
    %163 = vector.load %arg13[%c0_50, %c0_51] : memref<1x96xf32, #tpu.memory_space<vmem>>, vector<1x96xf32>
    %164 = vector.broadcast %163 : vector<1x96xf32> to vector<2x96xf32>
    %165 = arith.addf %162, %164 : vector<2x96xf32>
    %166 = vector.extract_strided_slice %160 {offsets = [0, 0], sizes = [2, 32], strides = [1, 1]} : vector<2x96xf32> to vector<2x32xf32>
    %167 = vector.extract_strided_slice %165 {offsets = [0, 0], sizes = [2, 32], strides = [1, 1]} : vector<2x96xf32> to vector<2x32xf32>
    %168 = arith.addf %166, %167 : vector<2x32xf32>
    %169 = arith.negf %168 : vector<2x32xf32>
    %170 = math.exp %169 : vector<2x32xf32>
    %cst_52 = arith.constant 1.000000e+00 : f32
    %171 = vector.broadcast %cst_52 : f32 to vector<2x32xf32>
    %172 = arith.addf %171, %170 : vector<2x32xf32>
    %173 = arith.divf %171, %172 : vector<2x32xf32>
    %174 = vector.extract_strided_slice %160 {offsets = [0, 32], sizes = [2, 32], strides = [1, 1]} : vector<2x96xf32> to vector<2x32xf32>
    %175 = vector.extract_strided_slice %165 {offsets = [0, 32], sizes = [2, 32], strides = [1, 1]} : vector<2x96xf32> to vector<2x32xf32>
    %176 = arith.addf %174, %175 : vector<2x32xf32>
    %177 = arith.negf %176 : vector<2x32xf32>
    %178 = math.exp %177 : vector<2x32xf32>
    %cst_53 = arith.constant 1.000000e+00 : f32
    %179 = vector.broadcast %cst_53 : f32 to vector<2x32xf32>
    %180 = arith.addf %179, %178 : vector<2x32xf32>
    %181 = arith.divf %179, %180 : vector<2x32xf32>
    %182 = vector.extract_strided_slice %160 {offsets = [0, 64], sizes = [2, 32], strides = [1, 1]} : vector<2x96xf32> to vector<2x32xf32>
    %183 = vector.extract_strided_slice %165 {offsets = [0, 64], sizes = [2, 32], strides = [1, 1]} : vector<2x96xf32> to vector<2x32xf32>
    %184 = arith.mulf %173, %183 : vector<2x32xf32>
    %185 = arith.addf %182, %184 : vector<2x32xf32>
    %186 = math.tanh %185 : vector<2x32xf32>
    %cst_54 = arith.constant 1.000000e+00 : f32
    %187 = vector.broadcast %cst_54 : f32 to vector<2x32xf32>
    %188 = arith.subf %187, %181 : vector<2x32xf32>
    %189 = arith.mulf %188, %186 : vector<2x32xf32>
    %190 = arith.mulf %181, %154 : vector<2x32xf32>
    %191 = arith.addf %189, %190 : vector<2x32xf32>
    %c0_55 = arith.constant 0 : index
    %c0_56 = arith.constant 0 : index
    %192 = vector.load %arg21[%c0_55, %c0_56] : memref<2x32xf32, #tpu.memory_space<vmem>>, vector<2x32xf32>
    tpu.vector_store %arg21[%c0_55, %c0_56], %191 {strides = array<i32>} : memref<2x32xf32, #tpu.memory_space<vmem>>, vector<2x32xf32>,
    %c0_57 = arith.constant 0 : index
    %c0_58 = arith.constant 0 : index
    %c0_59 = arith.constant 0 : index
    %193 = vector.load %arg19[%c0_57, %c0_58, %c0_59] : memref<1x2x32xf32, #tpu.memory_space<vmem>>, vector<1x2x32xf32>
    %194 = vector.shape_cast %193 : vector<1x2x32xf32> to vector<2x32xf32>
    %195 = vector.shape_cast %191 : vector<2x32xf32> to vector<1x2x32xf32>
    tpu.vector_store %arg19[%c0_57, %c0_58, %c0_59], %195 {strides = array<i32>} : memref<1x2x32xf32, #tpu.memory_space<vmem>>, vector<1x2x32xf32>,
    %c0_60 = arith.constant 0 : index
    %c0_61 = arith.constant 0 : index
    %196 = vector.load %arg14[%c0_60, %c0_61] : memref<32x64xf32, #tpu.memory_space<vmem>>, vector<32x64xf32>
    %cst_62 = arith.constant dense<0.000000e+00> : vector<2x64xf32>
    %197 = tpu.matmul %191, %196, %cst_62 {dimension_numbers = #tpu.dot_dimension_numbers<[1], [0], [0], [1], [0, 0, 1, 1], [], []>} : vector<2x32xf32>, vector<32x64xf32>, vector<2x64xf32> -> vector<2x64xf32>
    %c0_63 = arith.constant 0 : index
    %c0_64 = arith.constant 0 : index
    %198 = vector.load %arg15[%c0_63, %c0_64] : memref<1x64xf32, #tpu.memory_space<vmem>>, vector<1x64xf32>
    %199 = vector.broadcast %198 : vector<1x64xf32> to vector<2x64xf32>
    %200 = arith.addf %197, %199 : vector<2x64xf32>
    %cst_65 = arith.constant 0.000000e+00 : f32
    %201 = vector.broadcast %cst_65 : f32 to vector<2x64xf32>
    %202 = arith.maximumf %200, %201 : vector<2x64xf32>
    %c0_66 = arith.constant 0 : index
    %c0_67 = arith.constant 0 : index
    %203 = vector.load %arg16[%c0_66, %c0_67] : memref<64x128xf32, #tpu.memory_space<vmem>>, vector<64x128xf32>
    %cst_68 = arith.constant dense<0.000000e+00> : vector<2x128xf32>
    %204 = tpu.matmul %202, %203, %cst_68 {dimension_numbers = #tpu.dot_dimension_numbers<[1], [0], [0], [1], [0, 0, 1, 1], [], []>} : vector<2x64xf32>, vector<64x128xf32>, vector<2x128xf32> -> vector<2x128xf32>
    %c0_69 = arith.constant 0 : index
    %c0_70 = arith.constant 0 : index
    %205 = vector.load %arg17[%c0_69, %c0_70] : memref<1x128xf32, #tpu.memory_space<vmem>>, vector<1x128xf32>
    %206 = vector.broadcast %205 : vector<1x128xf32> to vector<2x128xf32>
    %207 = arith.addf %204, %206 : vector<2x128xf32>
    %c0_71 = arith.constant 0 : index
    %c0_72 = arith.constant 0 : index
    %c0_73 = arith.constant 0 : index
    %208 = vector.load %arg18[%c0_71, %c0_72, %c0_73] : memref<1x2x128xf32, #tpu.memory_space<vmem>>, vector<1x2x128xf32>
    %209 = vector.shape_cast %208 : vector<1x2x128xf32> to vector<2x128xf32>
    %210 = vector.shape_cast %207 : vector<2x128xf32> to vector<1x2x128xf32>
    tpu.vector_store %arg18[%c0_71, %c0_72, %c0_73], %210 {strides = array<i32>} : memref<1x2x128xf32, #tpu.memory_space<vmem>>, vector<1x2x128xf32>,
    return
  }
  func.func @transform_0(%arg0: i32) -> (i32, i32, i32) {
    %c0_i32 = arith.constant 0 : i32
    %c0_i32_0 = arith.constant 0 : i32
    %c0_i32_1 = arith.constant 0 : i32
    return %arg0, %c0_i32, %c0_i32_0 : i32, i32, i32
  }
  func.func @transform_1(%arg0: i32) -> (i32, i32, i32) {
    %c0_i32 = arith.constant 0 : i32
    %c0_i32_0 = arith.constant 0 : i32
    %c0_i32_1 = arith.constant 0 : i32
    return %arg0, %c0_i32, %c0_i32_0 : i32, i32, i32
  }
  func.func @transform_2(%arg0: i32) -> (i32, i32) {
    %c0_i32 = arith.constant 0 : i32
    %c0_i32_0 = arith.constant 0 : i32
    %c0_i32_1 = arith.constant 0 : i32
    return %c0_i32, %c0_i32_0 : i32, i32
  }
  func.func @transform_3(%arg0: i32) -> (i32, i32) {
    %c0_i32 = arith.constant 0 : i32
    %c0_i32_0 = arith.constant 0 : i32
    %c0_i32_1 = arith.constant 0 : i32
    return %c0_i32, %c0_i32_0 : i32, i32
  }
  func.func @transform_4(%arg0: i32) -> (i32, i32) {
    %c0_i32 = arith.constant 0 : i32
    %c0_i32_0 = arith.constant 0 : i32
    %c0_i32_1 = arith.constant 0 : i32
    return %c0_i32, %c0_i32_0 : i32, i32
  }
  func.func @transform_5(%arg0: i32) -> (i32, i32) {
    %c0_i32 = arith.constant 0 : i32
    %c0_i32_0 = arith.constant 0 : i32
    %c0_i32_1 = arith.constant 0 : i32
    return %c0_i32, %c0_i32_0 : i32, i32
  }
  func.func @transform_6(%arg0: i32) -> (i32, i32) {
    %c0_i32 = arith.constant 0 : i32
    %c0_i32_0 = arith.constant 0 : i32
    %c0_i32_1 = arith.constant 0 : i32
    return %c0_i32, %c0_i32_0 : i32, i32
  }
  func.func @transform_7(%arg0: i32) -> (i32, i32) {
    %c0_i32 = arith.constant 0 : i32
    %c0_i32_0 = arith.constant 0 : i32
    %c0_i32_1 = arith.constant 0 : i32
    return %c0_i32, %c0_i32_0 : i32, i32
  }
  func.func @transform_8(%arg0: i32) -> (i32, i32) {
    %c0_i32 = arith.constant 0 : i32
    %c0_i32_0 = arith.constant 0 : i32
    %c0_i32_1 = arith.constant 0 : i32
    return %c0_i32, %c0_i32_0 : i32, i32
  }
  func.func @transform_9(%arg0: i32) -> (i32, i32) {
    %c0_i32 = arith.constant 0 : i32
    %c0_i32_0 = arith.constant 0 : i32
    %c0_i32_1 = arith.constant 0 : i32
    return %c0_i32, %c0_i32_0 : i32, i32
  }
  func.func @transform_10(%arg0: i32) -> (i32, i32) {
    %c0_i32 = arith.constant 0 : i32
    %c0_i32_0 = arith.constant 0 : i32
    %c0_i32_1 = arith.constant 0 : i32
    return %c0_i32, %c0_i32_0 : i32, i32
  }
  func.func @transform_11(%arg0: i32) -> (i32, i32) {
    %c0_i32 = arith.constant 0 : i32
    %c0_i32_0 = arith.constant 0 : i32
    %c0_i32_1 = arith.constant 0 : i32
    return %c0_i32, %c0_i32_0 : i32, i32
  }
  func.func @transform_12(%arg0: i32) -> (i32, i32) {
    %c0_i32 = arith.constant 0 : i32
    %c0_i32_0 = arith.constant 0 : i32
    %c0_i32_1 = arith.constant 0 : i32
    return %c0_i32, %c0_i32_0 : i32, i32
  }
  func.func @transform_13(%arg0: i32) -> (i32, i32) {
    %c0_i32 = arith.constant 0 : i32
    %c0_i32_0 = arith.constant 0 : i32
    %c0_i32_1 = arith.constant 0 : i32
    return %c0_i32, %c0_i32_0 : i32, i32
  }
  func.func @transform_14(%arg0: i32) -> (i32, i32) {
    %c0_i32 = arith.constant 0 : i32
    %c0_i32_0 = arith.constant 0 : i32
    %c0_i32_1 = arith.constant 0 : i32
    return %c0_i32, %c0_i32_0 : i32, i32
  }
  func.func @transform_15(%arg0: i32) -> (i32, i32) {
    %c0_i32 = arith.constant 0 : i32
    %c0_i32_0 = arith.constant 0 : i32
    %c0_i32_1 = arith.constant 0 : i32
    return %c0_i32, %c0_i32_0 : i32, i32
  }
  func.func @transform_16(%arg0: i32) -> (i32, i32) {
    %c0_i32 = arith.constant 0 : i32
    %c0_i32_0 = arith.constant 0 : i32
    %c0_i32_1 = arith.constant 0 : i32
    return %c0_i32, %c0_i32_0 : i32, i32
  }
  func.func @transform_17(%arg0: i32) -> (i32, i32, i32) {
    %c0_i32 = arith.constant 0 : i32
    %c0_i32_0 = arith.constant 0 : i32
    %c0_i32_1 = arith.constant 0 : i32
    return %arg0, %c0_i32, %c0_i32_0 : i32, i32, i32
  }
  func.func @transform_18(%arg0: i32) -> (i32, i32, i32) {
    %c0_i32 = arith.constant 0 : i32
    %c0_i32_0 = arith.constant 0 : i32
    %c0_i32_1 = arith.constant 0 : i32
    return %arg0, %c0_i32, %c0_i32_0 : i32, i32, i32
  }
  func.func @transform_19(%arg0: i32) -> (i32, i32, i32) {
    %c0_i32 = arith.constant 0 : i32
    %c0_i32_0 = arith.constant 0 : i32
    %c0_i32_1 = arith.constant 0 : i32
    return %arg0, %c0_i32, %c0_i32_0 : i32, i32, i32
  }
}

module attributes {stable_mosaic.version = 11 : i64} {
  func.func @_saa_kernel(%arg0: i32, %arg1: memref<2x8x32xf32, #tpu.memory_space<vmem>>, %arg2: memref<8x1xf32, #tpu.memory_space<vmem>>, %arg3: memref<32x64xf32, #tpu.memory_space<vmem>>, %arg4: memref<1x64xf32, #tpu.memory_space<vmem>>, %arg5: memref<64x2xf32, #tpu.memory_space<vmem>>, %arg6: memref<1x2xf32, #tpu.memory_space<vmem>>, %arg7: memref<2x2xf32, #tpu.memory_space<vmem>>) attributes {dimension_semantics = [#tpu.dimension_semantics<arbitrary>], iteration_bounds = array<i64: 1>, scalar_prefetch = 0 : i64, scratch_operands = 0 : i64, tpu.core_type = #tpu.core_type<tc>, window_params = [{pipeline_mode = #tpu.pipeline_mode<synchronous>, transform_indices = @transform_0, window_bounds = array<i64: 2, 8, 32>}, {pipeline_mode = #tpu.pipeline_mode<synchronous>, transform_indices = @transform_1, window_bounds = array<i64: 8, 1>}, {pipeline_mode = #tpu.pipeline_mode<synchronous>, transform_indices = @transform_2, window_bounds = array<i64: 32, 64>}, {pipeline_mode = #tpu.pipeline_mode<synchronous>, transform_indices = @transform_3, window_bounds = array<i64: 1, 64>}, {pipeline_mode = #tpu.pipeline_mode<synchronous>, transform_indices = @transform_4, window_bounds = array<i64: 64, 2>}, {pipeline_mode = #tpu.pipeline_mode<synchronous>, transform_indices = @transform_5, window_bounds = array<i64: 1, 2>}, {pipeline_mode = #tpu.pipeline_mode<synchronous>, transform_indices = @transform_6, window_bounds = array<i64: 2, 2>}]} {
    %c0 = arith.constant 0 : index
    %c0_0 = arith.constant 0 : index
    %c0_1 = arith.constant 0 : index
    %0 = vector.load %arg1[%c0, %c0_0, %c0_1] : memref<2x8x32xf32, #tpu.memory_space<vmem>>, vector<2x8x32xf32>
    "tpu.trace_start"() <{level = 10 : i32, message = "btc,bsc->bts"}> : () -> ()
    %cst = arith.constant dense<0.000000e+00> : vector<2x8x8xf32>
    %1 = tpu.matmul %0, %0, %cst {dimension_numbers = #tpu.dot_dimension_numbers<[2], [2], [1], [1], [0, 0, 0, 1, 1, 1], [0], [0]>} : vector<2x8x32xf32>, vector<2x8x32xf32>, vector<2x8x8xf32> -> vector<2x8x8xf32>
    "tpu.trace_stop"() : () -> ()
    %cst_2 = arith.constant 2.000000e+00 : f32
    %2 = vector.broadcast %cst_2 : f32 to vector<2x8x8xf32>
    %3 = arith.mulf %2, %1 : vector<2x8x8xf32>
    %cst_3 = arith.constant dense<0xFF800000> : vector<2x8xf32>
    %4 = vector.multi_reduction <maximumf>, %3, %cst_3 [2] : vector<2x8x8xf32> to vector<2x8xf32>
    %5 = vector.shape_cast %4 : vector<2x8xf32> to vector<2x8x1xf32>
    %6 = vector.broadcast %5 : vector<2x8x1xf32> to vector<2x8x8xf32>
    %7 = arith.subf %3, %6 : vector<2x8x8xf32>
    %8 = math.exp %7 : vector<2x8x8xf32>
    %cst_4 = arith.constant dense<0.000000e+00> : vector<2x8xf32>
    %9 = vector.multi_reduction <add>, %8, %cst_4 [2] : vector<2x8x8xf32> to vector<2x8xf32>
    %10 = vector.shape_cast %9 : vector<2x8xf32> to vector<2x8x1xf32>
    %11 = tpu.reciprocal %10 {approx = true} : vector<2x8x1xf32> -> vector<2x8x1xf32>
    %12 = vector.broadcast %11 : vector<2x8x1xf32> to vector<2x8x8xf32>
    %13 = arith.mulf %8, %12 : vector<2x8x8xf32>
    "tpu.trace_start"() <{level = 10 : i32, message = "bts,bsc->btc"}> : () -> ()
    %cst_5 = arith.constant dense<0.000000e+00> : vector<2x8x32xf32>
    %14 = tpu.matmul %13, %0, %cst_5 {dimension_numbers = #tpu.dot_dimension_numbers<[2], [1], [1], [2], [0, 0, 0, 1, 1, 2], [0], [0]>} : vector<2x8x8xf32>, vector<2x8x32xf32>, vector<2x8x32xf32> -> vector<2x8x32xf32>
    "tpu.trace_stop"() : () -> ()
    %c0_6 = arith.constant 0 : index
    %c0_7 = arith.constant 0 : index
    %15 = vector.load %arg2[%c0_6, %c0_7] : memref<8x1xf32, #tpu.memory_space<vmem>>, vector<8x1xf32>
    %16 = vector.shape_cast %15 : vector<8x1xf32> to vector<1x8x1xf32>
    %17 = vector.broadcast %16 : vector<1x8x1xf32> to vector<2x8x32xf32>
    %18 = arith.mulf %14, %17 : vector<2x8x32xf32>
    %cst_8 = arith.constant dense<0.000000e+00> : vector<2x32xf32>
    %19 = vector.multi_reduction <add>, %18, %cst_8 [1] : vector<2x8x32xf32> to vector<2x32xf32>
    %c0_9 = arith.constant 0 : index
    %c0_10 = arith.constant 0 : index
    %20 = vector.load %arg3[%c0_9, %c0_10] : memref<32x64xf32, #tpu.memory_space<vmem>>, vector<32x64xf32>
    %cst_11 = arith.constant dense<0.000000e+00> : vector<2x64xf32>
    %21 = tpu.matmul %19, %20, %cst_11 {dimension_numbers = #tpu.dot_dimension_numbers<[1], [0], [0], [1], [0, 0, 1, 1], [], []>} : vector<2x32xf32>, vector<32x64xf32>, vector<2x64xf32> -> vector<2x64xf32>
    %c0_12 = arith.constant 0 : index
    %c0_13 = arith.constant 0 : index
    %22 = vector.load %arg4[%c0_12, %c0_13] : memref<1x64xf32, #tpu.memory_space<vmem>>, vector<1x64xf32>
    %23 = vector.broadcast %22 : vector<1x64xf32> to vector<2x64xf32>
    %24 = arith.addf %21, %23 : vector<2x64xf32>
    %cst_14 = arith.constant 0.000000e+00 : f32
    %25 = vector.broadcast %cst_14 : f32 to vector<2x64xf32>
    %26 = arith.maximumf %24, %25 : vector<2x64xf32>
    %c0_15 = arith.constant 0 : index
    %c0_16 = arith.constant 0 : index
    %27 = vector.load %arg5[%c0_15, %c0_16] : memref<64x2xf32, #tpu.memory_space<vmem>>, vector<64x2xf32>
    %cst_17 = arith.constant dense<0.000000e+00> : vector<2x2xf32>
    %28 = tpu.matmul %26, %27, %cst_17 {dimension_numbers = #tpu.dot_dimension_numbers<[1], [0], [0], [1], [0, 0, 1, 1], [], []>} : vector<2x64xf32>, vector<64x2xf32>, vector<2x2xf32> -> vector<2x2xf32>
    %c0_18 = arith.constant 0 : index
    %c0_19 = arith.constant 0 : index
    %29 = vector.load %arg6[%c0_18, %c0_19] : memref<1x2xf32, #tpu.memory_space<vmem>>, vector<1x2xf32>
    %30 = vector.broadcast %29 : vector<1x2xf32> to vector<2x2xf32>
    %31 = arith.addf %28, %30 : vector<2x2xf32>
    %c0_20 = arith.constant 0 : index
    %c0_21 = arith.constant 0 : index
    %32 = vector.load %arg7[%c0_20, %c0_21] : memref<2x2xf32, #tpu.memory_space<vmem>>, vector<2x2xf32>
    tpu.vector_store %arg7[%c0_20, %c0_21], %31 {strides = array<i32>} : memref<2x2xf32, #tpu.memory_space<vmem>>, vector<2x2xf32>,
    return
  }
  func.func @transform_0(%arg0: i32) -> (i32, i32, i32) {
    %c0_i32 = arith.constant 0 : i32
    %c0_i32_0 = arith.constant 0 : i32
    %c0_i32_1 = arith.constant 0 : i32
    %c0_i32_2 = arith.constant 0 : i32
    return %c0_i32, %c0_i32_0, %c0_i32_1 : i32, i32, i32
  }
  func.func @transform_1(%arg0: i32) -> (i32, i32) {
    %c0_i32 = arith.constant 0 : i32
    %c0_i32_0 = arith.constant 0 : i32
    %c0_i32_1 = arith.constant 0 : i32
    return %c0_i32, %c0_i32_0 : i32, i32
  }
  func.func @transform_2(%arg0: i32) -> (i32, i32) {
    %c0_i32 = arith.constant 0 : i32
    %c0_i32_0 = arith.constant 0 : i32
    %c0_i32_1 = arith.constant 0 : i32
    return %c0_i32, %c0_i32_0 : i32, i32
  }
  func.func @transform_3(%arg0: i32) -> (i32, i32) {
    %c0_i32 = arith.constant 0 : i32
    %c0_i32_0 = arith.constant 0 : i32
    %c0_i32_1 = arith.constant 0 : i32
    return %c0_i32, %c0_i32_0 : i32, i32
  }
  func.func @transform_4(%arg0: i32) -> (i32, i32) {
    %c0_i32 = arith.constant 0 : i32
    %c0_i32_0 = arith.constant 0 : i32
    %c0_i32_1 = arith.constant 0 : i32
    return %c0_i32, %c0_i32_0 : i32, i32
  }
  func.func @transform_5(%arg0: i32) -> (i32, i32) {
    %c0_i32 = arith.constant 0 : i32
    %c0_i32_0 = arith.constant 0 : i32
    %c0_i32_1 = arith.constant 0 : i32
    return %c0_i32, %c0_i32_0 : i32, i32
  }
  func.func @transform_6(%arg0: i32) -> (i32, i32) {
    %c0_i32 = arith.constant 0 : i32
    %c0_i32_0 = arith.constant 0 : i32
    %c0_i32_1 = arith.constant 0 : i32
    return %c0_i32, %c0_i32_0 : i32, i32
  }
}

</mosaic_0001>

<bundles_post_ra>
// kernel: _idsta_core.3
= control target key start
LH: loop header
LB: loop body
LE: loop exit
PB: predicated region body
PF: predicated region fallthrough
CT: control target
= control target key end

     0   :  { %vm25_vm0 = vcmask 261120   ;;  %v661_v0 = vmov 0.0   ;;  %vm662_vm1 = vmmov 0   ;;  %vm174_vm2 = vcmask 64512   ;;  %s773_s0 = inlined_call_operand.vmem [shape: f32[2,8,32], index: 0, kind: input, shape index: {}]   ;;  %s774_s1 = inlined_call_operand.vmem [shape: f32[8,1], index: 1, kind: input, shape index: {}]   ;;  %s775_s2 = inlined_call_operand.vmem [shape: f32[32,64], index: 2, kind: input, shape index: {}]   ;;  %s776_s4 = inlined_call_operand.vmem [shape: f32[64,2], index: 4, kind: input, shape index: {}]   ;;  %s777_s3 = inlined_call_operand.vmem [shape: f32[1,64], index: 3, kind: input, shape index: {}]   ;;  %s778_s5 = inlined_call_operand.vmem [shape: f32[1,2], index: 5, kind: input, shape index: {}]   ;;  %s779_s6 = inlined_call_operand.vmem [shape: f32[2,2], index: 6, kind: output, shape index: {}]  }
   0x1   :  { %580 = vmatprep.subr.mxu0 %v661_v0  ;;  %v23_v1 = vld [vmem:[%s773_s0] sm:$0xff]  ;;  %582 = vmatprep.mubr.msk.f32.mxu0 %vm662_vm1, %v661_v0  ;;  %v24_v2 = vld [vmem:[%s773_s0 + $0x8] sm:$0xff]  ;;  %v663_v21 = vmov 0   ;;  %v664_v32 = vmov 0.0|0.0   ;;  %v367_v33 = vld [vmem:[%s775_s2 + $0x10] sm:$0xff]  ;;  %vm378_vm3 = vcmask 1041409  }
   0x2   :  { %581 = vmatpush3.xpose.msk.msra.mxu0 %vm25_vm0, %v23_v1  ;;  %595 = vmatprep.subr.mxu1 %v661_v0  ;;  %v343_v22 = vld [vmem:[%s774_s1] sm:$0xff]  ;;  %v366_v30 = vld [vmem:[%s775_s2 + $0x8] sm:$0xff]  ;;  %v368_v34 = vld [vmem:[%s775_s2 + $0x18] sm:$0xff]  ;;  %vm468_vm4 = vcmask 523264   ;;  %vm542_vm5 = vcmask 9216  }
   0x3   :  { %585 = vmatprep.subr.mxu0 %v661_v0  ;;  %596 = vmatpush3.msra.mxu1 %v24_v2  ;;  %v365_v29 = vld [vmem:[%s775_s2] sm:$0xff]  ;;  %v634_v35 = vpack.c.bf16 %v368_v34, %v367_v33  ;;  %v454_v37 = vld [vmem:[%s776_s4 + $0x8] sm:$0xff]  ;;  %v455_v38 = vld [vmem:[%s776_s4 + $0x10] sm:$0xff] }
   0x4   :  { %597 = vmatprep.mubr.msk.f32.mxu1 %vm662_vm1, %v661_v0  ;;  %652 = vset.pattern.permute.xlu0 %v663_v21  ;;  %v631_v31 = vpack.c.bf16 %v366_v30, %v365_v29  ;;  %v453_v36 = vld [vmem:[%s776_s4] sm:$0xff]  ;;  %v456_v40 = vld [vmem:[%s776_s4 + $0x18] sm:$0xff]  ;;  %v458_v43 = vld [vmem:[%s776_s4 + $0x28] sm:$0xff] }
   0x5   :  { %583 = vmatmul.mubr.msk.f32.vlgmr.msra.gmra.mrb[0].mxu0 %vm25_vm0, %v23_v1  ;;  %636 = vmatprep.subr.bf16.mxu1 %v664_v32  ;;  %v637_v39 = vpack.c.bf16 %v454_v37, %v453_v36  ;;  %v640_v41 = vpack.c.bf16 %v456_v40, %v455_v38  ;;  %v457_v42 = vld [vmem:[%s776_s4 + $0x20] sm:$0xff] }
   0x6   :  { %586 = vmatpush3.xpose.msk.msra.mxu0 %vm25_vm0, %v24_v2  ;;  %587 = vmatprep.mubr.msk.f32.mxu0 %vm662_vm1, %v661_v0  ;;  %v643_v44 = vpack.c.bf16 %v458_v43, %v457_v42 }
   0x7   :  { %590 = vmatprep.subr.mxu0 %v661_v0 }
   0x9   :  { %588 = vmatmul.mubr.msk.f32.vlgmr.msra.gmra.mrb[2].mxu0 %vm25_vm0, %v24_v2 }
   0xa   :  { %591 = vmatpush3.msra.mxu0 %v23_v1  ;;  %592 = vmatprep.mubr.msk.f32.mxu0 %vm662_vm1, %v661_v0 }
   0xb   :  { %630 = vmatprep.subr.bf16.mxu0 %v664_v32 }
  0xd8   :  { %v95_v3 = vpop.f32.mrb[0].mxu0 }
  0xd9   :  { %v172_v4 = vmul.f32 2.0, %v95_v3  ;;  %v584_v5 = vpop.f32.mrb[1].mxu0  ;;  %v459_v3 = vld [vmem:[%s776_s4 + $0x30] sm:$0xff] }
  0xdb   :  { %v175_v6 = vsel %vm174_vm2, %v172_v4, -inf }
  0xdc   :  { %176 = vmax.xlane.f32.xlu0 %v175_v6  ;;  %v168_v7 = vpop.f32.mrb[2].mxu0  ;;  %v554_v6 = vld [vmem:[%s777_s3] ss:$0 sm:$0xff] }
  0xdd   :  { %v173_v8 = vmul.f32 2.0, %v168_v7  ;;  %v589_v9 = vpop.f32.mrb[3].mxu0 }
  0xdf   :  { %v178_v10 = vsel %vm174_vm2, %v173_v8, -inf }
  0xe0   :  { %179 = vmax.xlane.f32.xlu0 %v178_v10 }
  0xf6   :  { %346 = vperm.xlu0 %652, %v343_v22  }
 0x169   :  { %v177_v11 = vpop.xlane.xlu0 %176 }
 0x16a   :  { %v181_v12 = vsub.f32 %v172_v4, %v177_v11  ;;  %v460_v4 = vld [vmem:[%s776_s4 + $0x38] sm:$0xff]  ;;  %v556_v11 = vld [vmem:[%s778_s5] ss:$0 sm:$0xff] }
 0x16b   :  { %v646_v5 = vpack.c.bf16 %v460_v4, %v459_v3 }
 0x16c   :  { %v183_v13 = vmul.f32 1.442695, %v181_v12 }
 0x16d   :  { %v180_v14 = vpop.xlane.xlu0 %179 }
 0x16e   :  { %653 = vpow2.f32 %v183_v13  ;;  %v182_v15 = vsub.f32 %v173_v8, %v180_v14 }
 0x170   :  { %v185_v16 = vmul.f32 1.442695, %v182_v15 }
 0x172   :  { %655 = vpow2.f32 %v185_v16 }
 0x175   :  { %v347_v45 = vpop.permute.xlu0 %346 }
 0x178   :  { %v654_v17 = vpop.eup %653 }
 0x179   :  { %v187_v18 = vsel %vm174_vm2, %v654_v17, 0.0 }
 0x17a   :  { %188 = vadd.xlane.f32.xlu1 %v187_v18 }
 0x17c   :  { %v656_v19 = vpop.eup %655 }
 0x17d   :  { %v190_v20 = vsel %vm174_vm2, %v656_v19, 0.0 }
 0x17e   :  { %191 = vadd.xlane.f32.xlu1 %v190_v20 }
 0x207   :  { %v189_v23 = vpop.xlane.xlu1 %188 }
 0x208   :  { %657 = vrcp.f32 %v189_v23 }
 0x20b   :  { %v192_v24 = vpop.xlane.xlu1 %191 }
 0x20c   :  { %659 = vrcp.f32 %v192_v24 }
 0x212   :  { %v658_v25 = vpop.eup %657 }
 0x213   :  { %v195_v26 = vmul.f32 %v658_v25, %v654_v17 }
 0x215   :  { %593 = vmatmul.mubr.msk.f32.vlgmr.msra.gmra.mrb[4].mxu0 %vm174_vm2, %v195_v26 }
 0x216   :  { %v660_v27 = vpop.eup %659  ;;  %608 = vmatprep.mubr.msk.f32.mxu0 %vm662_vm1, %v661_v0  ;;  %632 = vmatpush3.bf16.msra.mxu0 %v631_v31 }
 0x217   :  { %v196_v28 = vmul.f32 %v660_v27, %v656_v19  ;;  %633 = vmatprep.subr.bf16.mxu0 %v664_v32 }
 0x219   :  { %598 = vmatmul.mubr.msk.f32.vlgmr.msra.gmra.mrb[0].mxu1 %vm174_vm2, %v196_v28 }
 0x21a   :  { %627 = vmatprep.mubr.msk.f32.mxu1 %vm662_vm1, %v661_v0  ;;  %635 = vmatpush3.bf16.msra.mxu0 %v634_v35 }
 0x21b   :  { %638 = vmatpush3.bf16.msra.mxu1 %v637_v39 }
 0x21c   :  { %639 = vmatprep.subr.bf16.mxu1 %v664_v32 }
 0x21f   :  { %641 = vmatpush3.bf16.msra.mxu1 %v640_v41 }
 0x220   :  { %642 = vmatprep.subr.bf16.mxu1 %v664_v32 }
 0x223   :  { %644 = vmatpush3.bf16.msra.mxu1 %v643_v44 }
 0x224   :  { %645 = vmatprep.subr.bf16.mxu1 %v664_v32 }
 0x227   :  { %647 = vmatpush3.bf16.msra.mxu1 %v646_v5 }
 0x2e8   :  { %v266_v46 = vpop.f32.mrb[4].mxu0 }
 0x2e9   :  { %v349_v47 = vmul.f32 %v347_v45, %v266_v46  ;;  %v594_v48 = vpop.f32.mrb[5].mxu0 }
 0x2eb   :  { %v351_v49 = vsel %vm25_vm0, %v349_v47, 0.0 }
 0x2ec   :  { %v352_v50 = vrot.slane %v351_v49, 4  ;;  %v339_v51 = vpop.f32.mrb[0].mxu1 }
 0x2ed   :  { %v350_v52 = vmul.f32 %v347_v45, %v339_v51  ;;  %v599_v53 = vpop.f32.mrb[1].mxu1 }
 0x2ee   :  { %v353_v54 = vadd.f32 %v352_v50, %v351_v49 }
 0x2ef   :  { %v358_v55 = vsel %vm25_vm0, %v350_v52, 0.0 }
 0x2f0   :  { %v354_v56 = vrot.slane %v353_v54, 2  ;;  %v359_v57 = vrot.slane %v358_v55, 4 }
 0x2f2   :  { %v355_v58 = vadd.f32 %v354_v56, %v353_v54  ;;  %v360_v59 = vadd.f32 %v359_v57, %v358_v55 }
 0x2f4   :  { %v361_v60 = vrot.slane %v360_v59, 2  ;;  %v356_v61 = vrot.slane %v355_v58, 1 }
 0x2f6   :  { %v362_v62 = vadd.f32 %v361_v60, %v360_v59  ;;  %v357_v0 = vadd.f32 %v356_v61, %v355_v58 }
 0x2f8   :  { %v363_v63 = vrot.slane %v362_v62, 1 }
 0x2fa   :  { %v364_v1 = vadd.f32 %v363_v63, %v362_v62 }
 0x2fc   :  { %v379_v2 = vsel %vm378_vm3, %v364_v1, %v357_v0 }
 0x2fd   :  { %609 = vmatmul.mubr.msk.f32.vlgmr.msra.gmra.mrb[6].mxu0 %vm25_vm0, %v379_v2 }
 0x3d0   :  { %v448_v7 = vpop.f32.mrb[6].mxu0 }
 0x3d1   :  { %v449_v8 = vadd.f32 %v554_v6, %v448_v7  ;;  %v610_v9 = vpop.f32.mrb[7].mxu0 }
 0x3d3   :  { %v452_v10 = vmax.f32 %v449_v8, 0.0 }
 0x3d5   :  { %628 = vmatmul.mubr.msk.f32.vlgmr.msra.gmra.mrb[2].mxu1 %vm468_vm4, %v452_v10 }
 0x4a8   :  { %v538_v12 = vpop.f32.mrb[2].mxu1 }
 0x4a9   :  { %v539_v13 = vadd.f32 %v556_v11, %v538_v12  ;;  %v629_v14 = vpop.f32.mrb[3].mxu1 }
 0x4ab   :  { %543 = vst.msk [vmem:[%s779_s6] sm:$0x3] %vm542_vm5, %v539_v13 }

// kernel: _idsta_core.2
= control target key start
LH: loop header
LB: loop body
LE: loop exit
PB: predicated region body
PF: predicated region fallthrough
CT: control target
= control target key end

     0   :  { %s2695_s0 = inlined_call_operand.vmem [shape: f32[8,14,64], index: 0, kind: input, shape index: {}]   ;;  %s2696_s1 = inlined_call_operand.vmem [shape: f32[8,2,6], index: 1, kind: input, shape index: {}]   ;;  %s2697_s2 = inlined_call_operand.vmem [shape: f32[64,32], index: 2, kind: input, shape index: {}]   ;;  %s2698_s3 = inlined_call_operand.vmem [shape: f32[1,32], index: 3, kind: input, shape index: {}]   ;;  %s2699_s4 = inlined_call_operand.vmem [shape: f32[32,32], index: 4, kind: input, shape index: {}]   ;;  %s2700_s5 = inlined_call_operand.vmem [shape: f32[32,32], index: 5, kind: input, shape index: {}]   ;;  %s2701_s6 = inlined_call_operand.vmem [shape: f32[1,32], index: 6, kind: input, shape index: {}]   ;;  %s2702_s7 = inlined_call_operand.vmem [shape: f32[1,32], index: 7, kind: input, shape index: {}]   ;;  %s2703_s8 = inlined_call_operand.vmem [shape: f32[32,32], index: 8, kind: input, shape index: {}]   ;;  %s2704_s9 = inlined_call_operand.vmem [shape: f32[64,96], index: 9, kind: input, shape index: {}]   ;;  %s2705_s10 = inlined_call_operand.vmem [shape: f32[32,96], index: 10, kind: input, shape index: {}]   ;;  %s2706_s11 = inlined_call_operand.vmem [shape: f32[1,96], index: 11, kind: input, shape index: {}]   ;;  %s2707_s12 = inlined_call_operand.vmem [shape: f32[1,96], index: 12, kind: input, shape index: {}]   ;;  %s2708_s13 = inlined_call_operand.vmem [shape: f32[32,64], index: 13, kind: input, shape index: {}]   ;;  %s2709_s14 = inlined_call_operand.vmem [shape: f32[1,64], index: 14, kind: input, shape index: {}]   ;;  %s2710_s15 = inlined_call_operand.vmem [shape: f32[64,128], index: 15, kind: input, shape index: {}]   ;;  %s2711_s16 = inlined_call_operand.vmem [shape: f32[1,128], index: 16, kind: input, shape index: {}]   ;;  %s2712_s17 = inlined_call_operand.vmem [shape: f32[8,2,128], index: 17, kind: output, shape index: {0}]   ;;  %s2713_s18 = inlined_call_operand.vmem [shape: f32[8,2,32], index: 18, kind: output, shape index: {1}]   ;;  %s2714_s19 = inlined_call_operand.vmem [shape: f32[8,2,6], index: 19, kind: output, shape index: {2}]  }
   0x1   :  { %2718 = sst [smem:[#allocation5_spill]] %s2695_s0  ;;  %s2373_s0 = smov 0  }
   0x2   :  { %2719 = sst [smem:[#allocation6_spill]] %s2696_s1 }
   0x3   :  { %2720 = sst [smem:[#allocation7_spill]] %s2697_s2 }
   0x4   :  { %2721 = sst [smem:[#allocation8_spill]] %s2698_s3 }
   0x5   :  { %2722 = sst [smem:[#allocation9_spill]] %s2709_s14 }
   0x6   :  { %2723 = sst [smem:[#allocation10_spill]] %s2710_s15 }
   0x7   :  { %2724 = sst [smem:[#allocation11_spill]] %s2711_s16 }
   0x8 LB: > { %2725 = sst [smem:[#allocation4_spill]] %s2253_s0  ;;  %s2379_s30 = sadd.s32 4294967295, %s2253_s0   ;;  %s2253_s0 = sphi %s2373_s0, %s30_s0  }
   0x9   : > { %p1893_p0 = scmp.ge.s32.totalorder %s2253_s0, 1  ;;  %p551_p1 = scmp.lt.s32.totalorder %s2253_s0, 9 }
   0xb   : > { %p552_p2 = pnand %p1893_p0, %p551_p1 }
   0xc   : > { %p618_p3 = scmp.lt.s32.totalorder (!%p552_p2), %s2379_s30, 7  ;;  %s2726_s23 = sld [smem:[#allocation5_spill]] (!%p552_p2) }
   0xd   : > { %555 = sbr.rel (%p552_p2) target bundleno = 2278 (0x8e6), region = 88  ;;  %s2727_s26 = sld [smem:[#allocation6_spill]] (!%p552_p2) }
   0xe   : > { %p1900_p4 = scmp.ne.s32.totalorder (!%p552_p2), %s2379_s30, 0 }
  0x14   : > { %s619_s20 = scalar_select %p618_p3, %s2379_s30, 7 }
  0x15   : > { %642 = sbr.rel (%p1900_p4) target bundleno = 28 (0x1c), region = 92  ;;  %vm643_vm0 = vcmask (!%p1900_p4), 254976   ;;  %v2255_v0 = vmov (!%p1900_p4), 0.0  }
  0x16   : > { %s1927_s21 = sshll.u32 %s619_s20, 4  ;;  %s2385_s1 = sshll.u32 %s619_s20, 1  ;;  %644 = vst.msk [vmem:[#allocation2] sm:$0x3] (!%p1900_p4), %vm643_vm0, %v2255_v0  ;;  %645 = vst.msk [vmem:[#allocation3] sm:$0x3] (!%p1900_p4), %vm643_vm0, %v2255_v0 }
  0x17   : > { %s2390_s24 = scalar_lea.vmem %s2726_s23, %s1927_s21  ;;  %s626_s27 = scalar_lea.vmem %s2727_s26, %s2385_s1  ;;  %646 = vst.msk [vmem:[#allocation3 + $0x2] sm:$0x3] (!%p1900_p4), %vm643_vm0, %v2255_v0  ;;  %647 = vst.msk [vmem:[#allocation3 + $0x4] sm:$0x3] (!%p1900_p4), %vm643_vm0, %v2255_v0 }
  0x18   : > { %s630_s0 = scalar_lea.vmem %s2712_s17, %s2385_s1  ;;  %s634_s14 = scalar_lea.vmem %s2713_s18, %s2385_s1  ;;  %648 = vst.msk [vmem:[#allocation3 + $0x6] sm:$0x3] (!%p1900_p4), %vm643_vm0, %v2255_v0  ;;  %649 = vst.msk [vmem:[#allocation3 + $0x8] sm:$0x3] (!%p1900_p4), %vm643_vm0, %v2255_v0 }
  0x19   : > { %s638_s2 = scalar_lea.vmem %s2714_s19, %s2385_s1 }
  0x1c PF: > { %s2728_s16 = sld [smem:[#allocation7_spill]]  ;;  %vm667_vm1 = vcmask 523264   ;;  %v2256_v6 = vmov 0.0|0.0   ;;  %v650_v10 = vld [vmem:[%s2390_s24] sm:$0xff]  ;;  %v753_v12 = vld [vmem:[%s2699_s4 + $0x8] sm:$0xff]  ;;  %v754_v14 = vld [vmem:[%s2699_s4 + $0x10] sm:$0xff] }
  0x1d   : > { %2111 = vmatprep.subr.bf16.mxu1 %v2256_v6  ;;  %1999 = vmatprep.mubr.msk.f32.mxu0 %vm667_vm1, %v650_v10  ;;  %v752_v11 = vld [vmem:[%s2699_s4] sm:$0xff]  ;;  %v755_v15 = vld [vmem:[%s2699_s4 + $0x18] sm:$0xff]  ;;  %v651_v21 = vld [vmem:[%s2390_s24 + $0x8] sm:$0x3f]  ;;  %vm2257_vm2 = vmmov 0   ;;  %v2258_v25 = vmov 0.0  }
  0x1e   : > { %v2112_v13 = vpack.c.bf16 %v753_v12, %v752_v11  ;;  %v2115_v19 = vpack.c.bf16 %v755_v15, %v754_v14  ;;  %v830_v22 = vld [vmem:[%s2700_s5] sm:$0xff]  ;;  %v831_v23 = vld [vmem:[%s2700_s5 + $0x8] sm:$0xff]  ;;  %2010 = vmatprep.mubr.msk.f32.mxu1 %vm2257_vm2, %v2258_v25  ;;  %vm756_vm3 = vcmask 261120   ;;  %v832_v27 = vld [vmem:[%s2700_s5 + $0x10] sm:$0xff]  ;;  %s2729_s15 = sld [smem:[#allocation8_spill]]  ;;  %vm843_vm4 = vcmask 1045504  }
  0x1f   : > { %v2117_v24 = vpack.c.bf16 %v831_v23, %v830_v22  ;;  %v2459_v26 = vld [vmem:[#allocation2] sm:$0x3]  ;;  %v833_v28 = vld [vmem:[%s2700_s5 + $0x18] sm:$0xff]  ;;  %vm947_vm5 = vcmask 257026   ;;  %vm956_vm6 = vcmask 259076   ;;  %vm937_vm7 = vcmask 254976  }
  0x20   : > { %2113 = vmatpush3.bf16.msra.mxu1 %v2112_v13  ;;  %v2121_v29 = vpack.c.bf16 %v833_v28, %v832_v27  ;;  %v1905_v42 = vld [vmem:[%s2701_s6] ss:$0 sm:$0xff]  ;;  %vm965_vm8 = vcmask 261126   ;;  %s2259_s21 = smov 126   ;;  %s2260_s23 = smov 125   ;;  %vm1154_vm9 = vcmask 7168  }
  0x21   : > { %2114 = vmatprep.subr.bf16.mxu1 %v2256_v6  ;;  %v1908_v56 = vld [vmem:[%s2702_s7] ss:$0 sm:$0xff]  ;;  %s2261_s25 = smov 127   ;;  %s1167_s3 = ssub.s32 0, %s2379_s30  ;;  %vm1156_vm10 = vcmask 15360   ;;  %vm1158_vm11 = vcmask 23552  }
  0x22   : > { %v652_v1 = vld [vmem:[%s2728_s16] sm:$0xff]  ;;  %v653_v2 = vld [vmem:[%s2728_s16 + $0x8] sm:$0xff]  ;;  %v654_v3 = vld [vmem:[%s2728_s16 + $0x10] sm:$0xff]  ;;  %s1909_s26 = smin.u32 %s2379_s30, %s1167_s3  ;;  %p1166_p5 = scmp.lt.s32.totalorder %s2379_s30, 0  ;;  %vm1160_vm12 = vcmask 31744   ;;  %vm1162_vm13 = vcmask 39936  }
  0x23   : > { %v2095_v4 = vpack.c.bf16 %v653_v2, %v652_v1  ;;  %v655_v5 = vld [vmem:[%s2728_s16 + $0x18] sm:$0xff]  ;;  %v656_v8 = vld [vmem:[%s2728_s16 + $0x20] sm:$0xff]  ;;  %v657_v9 = vld [vmem:[%s2728_s16 + $0x28] sm:$0xff]  ;;  %2197 = sdivrem.u32 %s1909_s26, 5  ;;  %vm1164_vm14 = vcmask 41984   ;;  %p1913_p7 = scmp.lt.s32.totalorder %s2379_s30, 2 }
  0x24   : > { %v2099_v7 = vpack.c.bf16 %v655_v5, %v654_v3  ;;  %v2103_v16 = vpack.c.bf16 %v657_v9, %v656_v8  ;;  %v658_v17 = vld [vmem:[%s2728_s16 + $0x30] sm:$0xff]  ;;  %v659_v18 = vld [vmem:[%s2728_s16 + $0x38] sm:$0xff]  ;;  %2116 = vmatpush3.bf16.msra.mxu1 %v2115_v19  ;;  %v1901_v30 = vld [vmem:[%s2729_s15] ss:$0 sm:$0xff]  ;;  %s2262_s15 = smov 124   ;;  %vm1204_vm15 = vcmask (!%p1913_p7), 1041408  }
  0x25   : > { %2096 = vmatprep.subr.bf16.mxu0 %v2095_v4  ;;  %v2107_v20 = vpack.c.bf16 %v659_v18, %v658_v17  ;;  %2118 = vmatprep.subr.bf16.mxu1 %v2117_v24  ;;  %v2502_v12 = vld [vmem:[%s626_s27] sm:$0x3]  ;;  %s2263_s27 = smov 123   ;;  %vm1206_vm0 = vcmask (!%p1913_p7), 1043456   ;;  %p1296_p8 = scmp.ge.s32.totalorder (!%p1913_p7), %s2379_s30, 3 }
  0x26   : > { %2098 = vmatpush3.bf16.msra.mxu0 %v2095_v4  ;;  %v1074_v13 = vrot.slane %v2502_v12, 4  ;;  %v1092_v14 = vrot.slane %v2502_v12, 2  ;;  %v1056_v15 = vrot.slane %v2502_v12, 6  ;;  %p1299_p9 = scmp.ge.s32.totalorder (!%p1913_p7), %s2379_s30, 4 }
  0x27   : > { %2100 = vmatprep.subr.bf16.mxu0 %v2099_v7  ;;  %2011 = vmatmul.mubr.msk.f32.vlgmr.msra.gmra.mrb[0].mxu1 %vm756_vm3, %v2459_v26 }
  0x28   : > { %2120 = vmatpush3.bf16.msra.mxu1 %v2117_v24 }
  0x29   : > { %2122 = vmatprep.subr.bf16.mxu1 %v2121_v29 }
  0x2a   : > { %2102 = vmatpush3.bf16.msra.mxu0 %v2099_v7 }
  0x2b   : > { %2104 = vmatprep.subr.bf16.mxu0 %v2103_v16 }
  0x2c   : > { %2124 = vmatpush3.bf16.msra.mxu1 %v2121_v29  ;;  %s2198_s28 = spop.drf %2197 }
  0x2d   : > { %s1171_s29 = ssub.s32 0, %s2198_s28 }
  0x2e   : > { %2106 = vmatpush3.bf16.msra.mxu0 %v2103_v16  ;;  %v2264_v16 = vmov 0   ;;  %s2736_s29 = smov (!%p1166_p5, %s1171_s29), %s2198_s28 }
  0x2f   : > { %2108 = vmatprep.subr.bf16.mxu0 %v2107_v20  ;;  %2195 = vset.pattern.permute.xlu0 %v2264_v16  ;;  %p1911_p6 = scmp.lt.s32.totalorder %s2736_s29, 0  ;;  %s1177_s24 = sadd.s32 5, %s2736_s29 }
  0x30   : > { %2196 = vset.pattern.permute.xlu1 %v2264_v16 }
  0x31   : > { %s2738_s24 = smov (!%p1911_p6, %s1177_s24), %s2736_s29 }
  0x32   : > { %2110 = vmatpush3.bf16.msra.mxu0 %v2107_v20  ;;  %s1912_s20 = sshll.u32 %s2738_s24, 1 }
  0x33   : > { %s1180_s22 = scalar_lea.vmem [#allocation3], %s1912_s20 }
  0x34   : > { %1181 = vst.msk [vmem:[%s1180_s22] sm:$0x3] %vm937_vm7, %v2459_v26 }
  0x35   : > { %2000 = vmatmul.mubr.msk.f32.vlgmr.msra.gmra.mrb[0].mxu0 %vm667_vm1, %v651_v21 }
  0xfa   : > { %v826_v40 = vpop.f32.mrb[0].mxu1 }
  0xfb   : > { %v2012_v41 = vpop.f32.mrb[1].mxu1  ;;  %v942_v45 = vrot.slane %v826_v40, 6  ;;  %v951_v47 = vrot.slane %v826_v40, 4  ;;  %v960_v48 = vrot.slane %v826_v40, 2 }
 0x108   : > { %v2001_v31 = vpop.f32.mrb[0].mxu0 }
 0x109   : > { %v746_v32 = vadd.f32 %v2001_v31, %v1901_v30  ;;  %v740_v33 = vpop.f32.mrb[1].mxu0 }
 0x10a   : > { %v2472_v34 = vadd.f32 %v1901_v30, %v740_v33 }
 0x10b   : > { %v750_v35 = vmax.f32 %v746_v32, 0.0 }
 0x10c   : > { %v749_v36 = vmax.f32 %v2472_v34, 0.0 }
 0x10d   : > { %v2475_v37 = vrot.slane %v750_v35, 2 }
 0x10e   : > { %v2479_v38 = vrot.slane %v749_v36, 2 }
 0x110   : > { %v846_v39 = vsel %vm843_vm4, %v2479_v38, %v2475_v37 }
 0x111   : > { %2021 = vmatprep.mubr.msk.f32.mxu1 %vm756_vm3, %v846_v39 }
 0x112   : > { %2022 = vmatmul.mubr.msk.f32.vlgmr.msra.gmra.mrb[2].mxu1 %vm756_vm3, %v2475_v37 }
 0x1e5   : > { %v2023_v43 = vpop.f32.mrb[2].mxu1 }
 0x1e6   : > { %v923_v44 = vadd.f32 %v2023_v43, %v1905_v42  ;;  %v917_v46 = vpop.f32.mrb[3].mxu1 }
 0x1e7   : > { %v918_v49 = vadd.f32 %v1905_v42, %v917_v46 }
 0x1e8   : > { %v969_v50 = vadd.f32 %v923_v44, %v826_v40  ;;  %v975_v51 = vadd.f32 %v942_v45, %v923_v44 }
 0x1e9   : > { %v928_v52 = vadd.f32 %v918_v49, %v826_v40  ;;  %v944_v53 = vadd.f32 %v942_v45, %v918_v49  ;;  %v953_v54 = vadd.f32 %v951_v47, %v918_v49  ;;  %v962_v55 = vadd.f32 %v960_v48, %v918_v49 }
 0x1eb   : > { %2199 = vtanh.f32 %v928_v52 }
 0x1ec   : > { %2201 = vtanh.f32 %v944_v53 }
 0x1ed   : > { %2203 = vtanh.f32 %v953_v54 }
 0x1ee   : > { %2205 = vtanh.f32 %v962_v55 }
 0x1ef   : > { %2207 = vtanh.f32 %v969_v50 }
 0x1f0   : > { %2209 = vtanh.f32 %v975_v51 }
 0x1f5   : > { %v2200_v57 = vpop.eup %2199 }
 0x1f6   : > { %v2202_v58 = vpop.eup %2201  ;;  %v936_v0 = vmul.f32 %v2200_v57, %v1908_v56 }
 0x1f7   : > { %v2204_v59 = vpop.eup %2203  ;;  %v946_v60 = vmul.f32 %v2202_v58, %v1908_v56 }
 0x1f8   : > { %v2206_v61 = vpop.eup %2205  ;;  %v955_v62 = vmul.f32 %v2204_v59, %v1908_v56  ;;  %v938_v5 = vsel %vm937_vm7, %v936_v0, 0.0 }
 0x1f9   : > { %v948_v63 = vsel %vm947_vm5, %v946_v60, 0.0  ;;  %v2208_v1 = vpop.eup %2207  ;;  %v964_v3 = vmul.f32 %v2206_v61, %v1908_v56 }
 0x1fa   : > { %v957_v2 = vsel %vm956_vm6, %v955_v62, 0.0  ;;  %949 = vadd.xlane.f32.xlu0 %v948_v63  ;;  %v2210_v4 = vpop.eup %2209  ;;  %v971_v7 = vmul.f32 %v2208_v1, %v1908_v56 }
 0x1fb   : > { %958 = vadd.xlane.f32.xlu1 %v957_v2  ;;  %v966_v8 = vsel %vm965_vm8, %v964_v3, 0.0  ;;  %v977_v9 = vmul.f32 %v2210_v4, %v1908_v56 }
 0x1fc   : > { %v972_v10 = vsel %vm937_vm7, %v971_v7, 0.0 }
 0x1fd   : > { %v978_v11 = vsel %vm947_vm5, %v977_v9, 0.0 }
 0x1fe   : > { %939 = vadd.xlane.f32.xlu0 %v938_v5 }
 0x1ff   : > { %967 = vadd.xlane.f32.xlu1 %v966_v8 }
 0x202   : > { %973 = vadd.xlane.f32.xlu0 %v972_v10 }
 0x203   : > { %979 = vadd.xlane.f32.xlu1 %v978_v11 }
 0x214   : > { %1075 = vrot.lane.b32.xlu1 %v1074_v13, %s2259_s21  ;;  %s2265_s21 = smov 1  }
 0x218   : > { %1093 = vrot.lane.b32.xlu1 %v1092_v14, %s2260_s23  ;;  %1057 = vrot.lane.b32.xlu0 %v1056_v15, %s2261_s25  ;;  %s2266_s23 = smov 3   ;;  %s2267_s25 = smov 5  }
 0x21c   : > { %1109 = vrot.lane.b32.xlu1 %v2502_v12, %s2262_s15  ;;  %1121 = vrot.lane.b32.xlu0 %v1056_v15, %s2263_s27  ;;  %s2268_s15 = smov 2   ;;  %s2269_s27 = smov 4  }
 0x287   : > { %v950_v17 = vpop.xlane.xlu0 %949 }
 0x288   : > { %v959_v18 = vpop.xlane.xlu1 %958  ;;  %v982_v19 = vrot.slane %v950_v17, 2 }
 0x289   : > { %v986_v21 = vrot.slane %v959_v18, 4 }
 0x28b   : > { %v940_v20 = vpop.xlane.xlu0 %939 }
 0x28c   : > { %v968_v22 = vpop.xlane.xlu1 %967  ;;  %v984_v23 = vmax.f32 %v940_v20, %v982_v19 }
 0x28d   : > { %v990_v24 = vrot.slane %v968_v22, 6 }
 0x28e   : > { %v988_v27 = vmax.f32 %v984_v23, %v986_v21 }
 0x28f   : > { %v974_v30 = vpop.xlane.xlu0 %973 }
 0x290   : > { %v980_v28 = vpop.xlane.xlu1 %979  ;;  %v992_v29 = vmax.f32 %v988_v27, %v990_v24 }
 0x291   : > { %v995_v31 = vrot.slane %v980_v28, 2 }
 0x292   : > { %v993_v32 = vmax.f32 %v992_v29, %v974_v30 }
 0x293   : > { %v1058_v13 = vpop.permute.xlu0 %1057 }
 0x294   : > { %v997_v33 = vmax.f32 %v993_v32, %v995_v31  ;;  %v1076_v3 = vpop.permute.xlu1 %1075 }
 0x296   : > { %v998_v35 = vsub.f32 %v940_v20, %v997_v33  ;;  %v1002_v39 = vrot.slane %v997_v33, 6  ;;  %v1007_v40 = vrot.slane %v997_v33, 4  ;;  %v1012_v41 = vrot.slane %v997_v33, 2 }
 0x297   : > { %v1017_v49 = vsub.f32 %v974_v30, %v997_v33  ;;  %v1122_v27 = vpop.permute.xlu0 %1121 }
 0x298   : > { %v1004_v26 = vsub.f32 %v950_v17, %v1002_v39  ;;  %v1014_v42 = vsub.f32 %v968_v22, %v1012_v41  ;;  %v999_v43 = vmul.f32 1.442695, %v998_v35  ;;  %v1009_v44 = vsub.f32 %v959_v18, %v1007_v40  ;;  %v1094_v4 = vpop.permute.xlu1 %1093 }
 0x299   : > { %v1020_v47 = vsub.f32 %v980_v28, %v1002_v39  ;;  %v1018_v51 = vmul.f32 1.442695, %v1017_v49 }
 0x29a   : > { %v1005_v45 = vmul.f32 1.442695, %v1004_v26  ;;  %v1015_v46 = vmul.f32 1.442695, %v1014_v42  ;;  %v1010_v48 = vmul.f32 1.442695, %v1009_v44 }
 0x29b   : > { %v1021_v50 = vmul.f32 1.442695, %v1020_v47 }
 0x29c   : > { %2211 = vpow2.f32 %v1005_v45  ;;  %v1110_v18 = vpop.permute.xlu1 %1109 }
 0x29d   : > { %2213 = vpow2.f32 %v999_v43 }
 0x29e   : > { %2215 = vpow2.f32 %v1015_v46 }
 0x29f   : > { %2217 = vpow2.f32 %v1010_v48 }
 0x2a0   : > { %2219 = vpow2.f32 %v1021_v50 }
 0x2a1   : > { %2221 = vpow2.f32 %v1018_v51 }
 0x2a6   : > { %v2212_v52 = vpop.eup %2211 }
 0x2a7   : > { %v2214_v53 = vpop.eup %2213  ;;  %v1024_v54 = vrot.slane %v2212_v52, 2 }
 0x2a8   : > { %v2216_v55 = vpop.eup %2215 }
 0x2a9   : > { %v2218_v56 = vpop.eup %2217  ;;  %v1026_v57 = vadd.f32 %v2214_v53, %v1024_v54  ;;  %v1032_v59 = vrot.slane %v2216_v55, 6 }
 0x2aa   : > { %v1028_v58 = vrot.slane %v2218_v56, 4  ;;  %v2220_v61 = vpop.eup %2219 }
 0x2ab   : > { %v2222_v63 = vpop.eup %2221  ;;  %v1037_v0 = vrot.slane %v2220_v61, 2 }
 0x2ac   : > { %v1030_v60 = vadd.f32 %v1028_v58, %v1026_v57 }
 0x2ae   : > { %v1034_v62 = vadd.f32 %v1032_v59, %v1030_v60 }
 0x2b0   : > { %v1035_v1 = vadd.f32 %v2222_v63, %v1034_v62 }
 0x2b2   : > { %v1039_v2 = vadd.f32 %v1037_v0, %v1035_v1  ;;  %v1212_v0 = vld [vmem:[%s2703_s8 + $0x8] sm:$0xff] (!%p1913_p7)  ;;  %v1213_v1 = vld [vmem:[%s2703_s8 + $0x10] sm:$0xff] (!%p1913_p7) }
 0x2b4   : > { %2223 = vrcp.f32 %v1039_v2 }
 0x2be   : > { %v2224_v5 = vpop.eup %2223 }
 0x2bf   : > { %v1071_v7 = vrot.slane %v2224_v5, 4  ;;  %v1052_v8 = vrot.slane %v2224_v5, 6  ;;  %v1041_v9 = vmul.f32 %v2224_v5, %v2214_v53  ;;  %v1089_v11 = vrot.slane %v2224_v5, 2 }
 0x2c0   : > { %v1108_v14 = vmul.f32 %v2224_v5, %v2222_v63  ;;  %v2542_v5 = vld [vmem:[#allocation3 + $0x2] sm:$0x3] (!%p1913_p7) }
 0x2c1   : > { %v1054_v10 = vmul.f32 %v2212_v52, %v1052_v8  ;;  %v1042_v15 = vmul.f32 %v1041_v9, %v2502_v12  ;;  %v1073_v16 = vmul.f32 %v2218_v56, %v1071_v7  ;;  %v1091_v19 = vmul.f32 %v2216_v55, %v1089_v11  ;;  %v2546_v9 = vld [vmem:[#allocation3 + $0x6] sm:$0x3] (!%p1913_p7) }
 0x2c2   : > { %v1112_v20 = vmul.f32 %v1110_v18, %v1108_v14  ;;  %v1120_v24 = vmul.f32 %v2220_v61, %v1052_v8  ;;  %v2544_v8 = vld [vmem:[#allocation3 + $0x4] sm:$0x3] (!%p1913_p7)  ;;  %v2551_v14 = vld [vmem:[#allocation3 + $0x8] sm:$0x3] (!%p1913_p7) }
 0x2c3   : > { %v1060_v17 = vmul.f32 %v1058_v13, %v1054_v10  ;;  %1045 = vperm.xlu0 %2195, %v1042_v15   ;;  %v1078_v21 = vmul.f32 %v1076_v3, %v1073_v16  ;;  %v1096_v22 = vmul.f32 %v1094_v4, %v1091_v19  ;;  %v1214_v3 = vld [vmem:[%s2703_s8 + $0x18] sm:$0xff] (!%p1913_p7)  ;;  %v2540_v4 = vld [vmem:[#allocation3] sm:$0x3] (!%p1913_p7)  ;;  %v1196_v10 = vrot.slane (!%p1913_p7), %v2542_v5, 6 }
 0x2c4   : > { %v1124_v29 = vmul.f32 %v1122_v27, %v1120_v24  ;;  %v2129_v7 = vpack.c.bf16 (!%p1913_p7), %v1214_v3, %v1213_v1  ;;  %v1199_v11 = vrot.slane (!%p1913_p7), %v2544_v8, 4  ;;  %v1202_v13 = vrot.slane (!%p1913_p7), %v2546_v9, 2 }
 0x2c5   : > { %1063 = vperm.xlu1 %2196, %v1060_v17   ;;  %v1135_v23 = vrot.slane %v1060_v17, 2  ;;  %v1143_v28 = vrot.slane %v1096_v22, 6  ;;  %v1139_v30 = vrot.slane %v1078_v21, 4  ;;  %2225 = vtanh.f32 (!%p1913_p7), %v2551_v14 }
 0x2c6   : > { %v1150_v12 = vrot.slane %v1124_v29, 2 }
 0x2c7   : > { %1115 = vperm.xlu0 %2195, %v1112_v20  }
 0x2c9   : > { %1081 = vperm.xlu1 %2196, %v1078_v21  }
 0x2cb   : > { %1136 = vrot.lane.b32.xlu0 %v1135_v23, %s2265_s21 }
 0x2cd   : > { %1099 = vperm.xlu1 %2196, %v1096_v22  }
 0x2cf   : > { %1144 = vrot.lane.b32.xlu0 %v1143_v28, %s2266_s23  ;;  %v2226_v18 = vpop.eup (!%p1913_p7), %2225 }
 0x2d1   : > { %1127 = vperm.xlu1 %2196, %v1124_v29  }
 0x2d3   : > { %1151 = vrot.lane.b32.xlu0 %v1150_v12, %s2267_s25 }
 0x2d5   : > { %1140 = vrot.lane.b32.xlu1 %v1139_v30, %s2268_s15 }
 0x2d9   : > { %1147 = vrot.lane.b32.xlu1 %v1112_v20, %s2269_s27 }
 0x342   : > { %v1046_v31 = vpop.permute.xlu0 %1045 }
 0x343   : > { %v1049_v26 = vmul.f32 %v1046_v31, %v2479_v38 }
 0x344   : > { %v1064_v32 = vpop.permute.xlu1 %1063 }
 0x345   : > { %v1066_v33 = vmul.f32 %v1064_v32, %v2479_v38 }
 0x346   : > { %v1116_v35 = vpop.permute.xlu0 %1115 }
 0x347   : > { %v1068_v40 = vrot.slane %v1066_v33, 2  ;;  %v1118_v50 = vmul.f32 %v1116_v35, %v2475_v37 }
 0x348   : > { %v1082_v39 = vpop.permute.xlu1 %1081 }
 0x349   : > { %v1084_v41 = vmul.f32 %v1082_v39, %v2479_v38  ;;  %v1070_v44 = vadd.f32 %v1068_v40, %v1049_v26 }
 0x34a   : > { %v1137_v45 = vpop.permute.xlu0 %1136 }
 0x34b   : > { %v1086_v42 = vrot.slane %v1084_v41, 4  ;;  %v1155_v55 = vsel %vm1154_vm9, %v1042_v15, %v1137_v45  ;;  %v1205_v15 = vsel (!%p1913_p7), %vm1204_vm15, %v2540_v4, %v1196_v10 }
 0x34c   : > { %v1100_v43 = vpop.permute.xlu1 %1099  ;;  %v1207_v16 = vsel (!%p1913_p7), %vm1206_vm0, %v1205_v15, %v1199_v11 }
 0x34d   : > { %v1103_v46 = vmul.f32 %v1100_v43, %v2475_v37  ;;  %v1088_v47 = vadd.f32 %v1086_v42, %v1070_v44  ;;  %v1208_v17 = vsel (!%p1913_p7), %vm843_vm4, %v1207_v16, %v1202_v13 }
 0x34e   : > { %v1145_v53 = vpop.permute.xlu0 %1144  ;;  %2227 = vtanh.f32 (!%p1913_p7), %v1208_v17 }
 0x34f   : > { %v1105_v48 = vrot.slane %v1103_v46, 6 }
 0x350   : > { %v1128_v49 = vpop.permute.xlu1 %1127 }
 0x351   : > { %v1107_v51 = vadd.f32 %v1105_v48, %v1088_v47  ;;  %v1130_v52 = vmul.f32 %v1128_v49, %v2475_v37  ;;  %v1211_v37 = vld [vmem:[%s2703_s8] sm:$0xff] (!%p1913_p7) }
 0x352   : > { %v1152_v61 = vpop.permute.xlu0 %1151  ;;  %v2125_v2 = vpack.c.bf16 (!%p1913_p7), %v1212_v0, %v1211_v37 }
 0x353   : > { %v1119_v54 = vadd.f32 %v1118_v50, %v1107_v51  ;;  %v1132_v38 = vrot.slane %v1130_v52, 2 }
 0x354   : > { %v1141_v56 = vpop.permute.xlu1 %1140  ;;  %2126 = vmatprep.subr.bf16.mxu0 (!%p1913_p7), %v2125_v2 }
 0x355   : > { %v2520_v57 = vadd.f32 %v1132_v38, %v1119_v54  ;;  %v1157_v58 = vsel %vm1156_vm10, %v1155_v55, %v1141_v56  ;;  %1185 = sbr.rel (%p1913_p7) target bundleno = 1124 (0x464), region = 96  ;;  %2128 = vmatpush3.bf16.msra.mxu0 (!%p1913_p7), %v2125_v2 }
 0x356   : > { %v1159_v60 = vsel %vm1158_vm11, %v1157_v58, %v1145_v53  ;;  %2130 = vmatprep.subr.bf16.mxu0 (!%p1913_p7), %v2129_v7 }
 0x358   : > { %v1148_v59 = vpop.permute.xlu1 %1147  ;;  %v2228_v19 = vpop.eup (!%p1913_p7), %2227 }
 0x359   : > { %v1161_v62 = vsel %vm1160_vm12, %v1159_v60, %v1148_v59  ;;  %2132 = vmatpush3.bf16.msra.mxu0 (!%p1913_p7), %v2129_v7  ;;  %2032 = vmatprep.mubr.msk.f32.mxu0 (!%p1913_p7), %vm756_vm3, %v2228_v19 }
 0x35a   : > { %v1163_v63 = vsel %vm1162_vm13, %v1161_v62, %v1152_v61 }
 0x35b   : > { %1165 = vst.msk [vmem:[%s638_s2] sm:$0x3] %vm1164_vm14, %v1163_v63 }
 0x35c   : > { %2033 = vmatmul.mubr.msk.f32.vlgmr.msra.gmra.mrb[0].mxu0 %vm756_vm3, %v2226_v18  ;;  %s1297_s2 = scalar_select %p1296_p8, 1, 0 }
 0x35d   : > { %s1300_s15 = scalar_select %p1299_p9, 1, 0 }
 0x35e   : > { %s1298_s27 = scvt.s32.f32 %s1297_s2 }
 0x35f   : > { %s1301_s3 = scvt.s32.f32 %s1300_s15 }
 0x360   : > { %s1311_s26 = ssub.f32 1.0, %s1298_s27  ;;  %v1309_v20 = vstv %s1298_s27 }
 0x361   : > { %s1321_s28 = ssub.f32 1.0, %s1301_s3  ;;  %v1319_v22 = vstv %s1301_s3 }
 0x362   : > { %s1312_s29 = smul.f32 -1e+30, %s1311_s26 }
 0x363   : > { %s1322_s24 = smul.f32 -1e+30, %s1321_s28 }
 0x364   : > { %v1313_v24 = vstv %s1312_s29 }
 0x365   : > { %v1323_v32 = vstv %s1322_s24 }
 0x42f   : > { %v2034_v21 = vpop.f32.mrb[0].mxu0 }
 0x430   : > { %v1287_v23 = vpop.f32.mrb[1].mxu0  ;;  %v1320_v29 = vmul.f32 %v2034_v21, %v1319_v22 }
 0x431   : > { %v1303_v27 = vrot.slane %v1287_v23, 2  ;;  %v1310_v28 = vmul.f32 %v1309_v20, %v1287_v23  ;;  %v1306_v30 = vrot.slane %v1287_v23, 4 }
 0x432   : > { %v1324_v39 = vadd.f32 %v1323_v32, %v1320_v29 }
 0x433   : > { %v1305_v12 = vmax.f32 %v1287_v23, %v1303_v27  ;;  %v1314_v31 = vadd.f32 %v1313_v24, %v1310_v28 }
 0x435   : > { %v1308_v33 = vmax.f32 %v1305_v12, %v1306_v30  ;;  %v1316_v35 = vrot.slane %v1314_v31, 6 }
 0x437   : > { %v1318_v40 = vmax.f32 %v1308_v33, %v1316_v35 }
 0x439   : > { %v1325_v41 = vmax.f32 %v1318_v40, %v1324_v39 }
 0x43b   : > { %v1326_v26 = vsub.f32 %v1287_v23, %v1325_v41  ;;  %v1330_v42 = vrot.slane %v1325_v41, 6  ;;  %v1335_v43 = vrot.slane %v1325_v41, 4  ;;  %v1340_v44 = vrot.slane %v1325_v41, 2 }
 0x43c   : > { %v1346_v45 = vsub.f32 %v2034_v21, %v1325_v41 }
 0x43d   : > { %v1327_v46 = vmul.f32 1.442695, %v1326_v26  ;;  %v1332_v47 = vsub.f32 %v1287_v23, %v1330_v42  ;;  %v1337_v48 = vsub.f32 %v1287_v23, %v1335_v43  ;;  %v1342_v49 = vsub.f32 %v1287_v23, %v1340_v44 }
 0x43e   : > { %v1347_v50 = vmul.f32 1.442695, %v1346_v45 }
 0x43f   : > { %2229 = vpow2.f32 %v1327_v46  ;;  %v1333_v51 = vmul.f32 1.442695, %v1332_v47  ;;  %v1338_v52 = vmul.f32 1.442695, %v1337_v48  ;;  %v1343_v53 = vmul.f32 1.442695, %v1342_v49 }
 0x440   : > { %2231 = vpow2.f32 %v1347_v50 }
 0x441   : > { %2233 = vpow2.f32 %v1333_v51 }
 0x442   : > { %2235 = vpow2.f32 %v1338_v52 }
 0x443   : > { %2237 = vpow2.f32 %v1343_v53 }
 0x449   : > { %v2230_v54 = vpop.eup %2229 }
 0x44a   : > { %v2232_v38 = vpop.eup %2231  ;;  %v1364_v63 = vmul.f32 %v2230_v54, %v2540_v4 }
 0x44b   : > { %v2234_v55 = vpop.eup %2233  ;;  %v1349_v0 = vmul.f32 %v2232_v38, %v1319_v22 }
 0x44c   : > { %v2236_v56 = vpop.eup %2235  ;;  %v1351_v58 = vrot.slane %v2234_v55, 2 }
 0x44d   : > { %v2238_v59 = vpop.eup %2237  ;;  %v1355_v60 = vrot.slane %v2236_v56, 4  ;;  %v1371_v17 = vmul.f32 %v1349_v0, %v2551_v14 }
 0x44e   : > { %v1345_v61 = vmul.f32 %v2238_v59, %v1309_v20  ;;  %v1353_v62 = vadd.f32 %v2230_v54, %v1351_v58  ;;  %v1365_v37 = vmul.f32 %v1351_v58, %v2542_v5 }
 0x44f   : > { %v1367_v7 = vmul.f32 %v1355_v60, %v2544_v8 }
 0x450   : > { %v1357_v1 = vadd.f32 %v1355_v60, %v1353_v62  ;;  %v1359_v2 = vrot.slane %v1345_v61, 6  ;;  %v1366_v3 = vadd.f32 %v1365_v37, %v1364_v63 }
 0x452   : > { %v1361_v10 = vadd.f32 %v1359_v2, %v1357_v1  ;;  %v1368_v11 = vadd.f32 %v1367_v7, %v1366_v3  ;;  %v1369_v13 = vmul.f32 %v1359_v2, %v2546_v9 }
 0x454   : > { %v1362_v15 = vadd.f32 %v1361_v10, %v1349_v0  ;;  %v1370_v16 = vadd.f32 %v1369_v13, %v1368_v11 }
 0x456   : > { %2239 = vrcp.f32 %v1362_v15  ;;  %v1372_v18 = vadd.f32 %v1371_v17, %v1370_v16 }
 0x460   : > { %v2240_v19 = vpop.eup %2239 }
 0x461   : > { %v1373_v4 = vmul.f32 %v2240_v19, %v1372_v18 }
 0x463   : > { %1374 = vst.msk [vmem:[#allocation2] sm:$0x3] %vm937_vm7, %v1373_v4 }
 0x464 PF: > { %2145 = vmatprep.subr.bf16.mxu1 %v2256_v6  ;;  %v1468_v5 = vld [vmem:[%s2705_s10] sm:$0xff]  ;;  %v1469_v8 = vld [vmem:[%s2705_s10 + $0x8] sm:$0xff]  ;;  %v1470_v9 = vld [vmem:[%s2705_s10 + $0x10] sm:$0xff]  ;;  %2062 = vmatprep.mubr.msk.f32.mxu1 %vm2257_vm2, %v2258_v25  ;;  %s2270_s2 = smov 32   ;;  %s2271_s30 = smov 64  }
 0x465   : > { %1376 = vrot.lane.b32.xlu0 %v749_v36, %s2270_s2  ;;  %v2146_v14 = vpack.c.bf16 %v1469_v8, %v1468_v5  ;;  %v1471_v20 = vld [vmem:[%s2705_s10 + $0x18] sm:$0xff]  ;;  %2133 = vmatprep.subr.bf16.mxu0 %v2256_v6  ;;  %v1380_v21 = vld [vmem:[%s2704_s9] sm:$0xff]  ;;  %v1381_v22 = vld [vmem:[%s2704_s9 + $0x8] sm:$0xff]  ;;  %s2272_s28 = smov 96   ;;  %s2732_s25 = sld [smem:[#allocation9_spill]] }
 0x466   : > { %v1382_v34 = vld [vmem:[%s2704_s9 + $0x10] sm:$0xff]  ;;  %v1383_v36 = vld [vmem:[%s2704_s9 + $0x18] sm:$0xff]  ;;  %2051 = vmatprep.mubr.msk.f32.mxu0 %vm2257_vm2, %v2258_v25  ;;  %v2149_v23 = vpack.c.bf16 %v1471_v20, %v1470_v9  ;;  %v2134_v24 = vpack.c.bf16 %v1381_v22, %v1380_v21  ;;  %v1384_v28 = vld [vmem:[%s2704_s9 + $0x20] sm:$0xff]  ;;  %s2733_s27 = sld [smem:[#allocation11_spill]] }
 0x467   : > { %2147 = vmatpush3.bf16.msra.mxu1 %v2146_v14  ;;  %v2137_v27 = vpack.c.bf16 %v1383_v36, %v1382_v34  ;;  %v1385_v29 = vld [vmem:[%s2704_s9 + $0x28] sm:$0xff]  ;;  %v1386_v31 = vld [vmem:[%s2704_s9 + $0x30] sm:$0xff]  ;;  %v1387_v32 = vld [vmem:[%s2704_s9 + $0x38] sm:$0xff] }
 0x468   : > { %2148 = vmatprep.subr.bf16.mxu1 %v2256_v6  ;;  %2135 = vmatpush3.bf16.msra.mxu0 %v2134_v24  ;;  %v2140_v30 = vpack.c.bf16 %v1385_v29, %v1384_v28  ;;  %v2143_v33 = vpack.c.bf16 %v1387_v32, %v1386_v31  ;;  %v1918_v40 = vld [vmem:[%s2707_s12] ss:$0 sm:$0xff]  ;;  %v1588_v38 = vld [vmem:[%s2708_s13 + $0x8] sm:$0xff]  ;;  %v1589_v55 = vld [vmem:[%s2708_s13 + $0x10] sm:$0xff] }
 0x469   : > { %2136 = vmatprep.subr.bf16.mxu0 %v2256_v6  ;;  %v1587_v54 = vld [vmem:[%s2708_s13] sm:$0xff]  ;;  %v1590_v58 = vld [vmem:[%s2708_s13 + $0x18] sm:$0xff] }
 0x46a   : > { %v1375_v12 = vld [vmem:[#allocation2] sm:$0x3]  ;;  %v2152_v56 = vpack.c.bf16 %v1588_v38, %v1587_v54  ;;  %v2155_v59 = vpack.c.bf16 %v1590_v58, %v1589_v55 }
 0x46b   : > { %2150 = vmatpush3.bf16.msra.mxu1 %v2149_v23  ;;  %v1921_v5 = vld [vmem:[%s2732_s25] ss:$0 sm:$0xff] }
 0x46c   : > { %2151 = vmatprep.subr.bf16.mxu1 %v2256_v6  ;;  %2138 = vmatpush3.bf16.msra.mxu0 %v2137_v27  ;;  %v1923_v21 = vld [vmem:[%s2733_s27] ss:$0 sm:$0xff] }
 0x46d   : > { %2139 = vmatprep.subr.bf16.mxu0 %v2256_v6 }
 0x46e   : > { %2063 = vmatmul.mubr.msk.f32.vlgmr.msra.gmra.mrb[0].mxu1 %vm756_vm3, %v1375_v12 }
 0x46f   : > { %2073 = vmatprep.mubr.msk.f32.mxu1 %vm2257_vm2, %v2258_v25  ;;  %2153 = vmatpush3.bf16.msra.mxu1 %v2152_v56 }
 0x470   : > { %2141 = vmatpush3.bf16.msra.mxu0 %v2140_v30  ;;  %2154 = vmatprep.subr.bf16.mxu1 %v2256_v6 }
 0x471   : > { %2142 = vmatprep.subr.bf16.mxu0 %v2256_v6 }
 0x473   : > { %2156 = vmatpush3.bf16.msra.mxu1 %v2155_v59 }
 0x474   : > { %2144 = vmatpush3.bf16.msra.mxu0 %v2143_v33 }
 0x475   : > { %2157 = vmatprep.subr.bf16.mxu0 %v2256_v6 }
 0x4d7   : > { %v1377_v35 = vpop.permute.xlu0 %1376 }
 0x4d8   : > { %v1379_v39 = vsel %vm756_vm3, %v2520_v57, %v1377_v35  ;;  %v1916_v57 = vld [vmem:[%s2706_s11] ss:$0 sm:$0xff] }
 0x4d9   : > { %2052 = vmatmul.mubr.msk.f32.vlgmr.msra.gmra.mrb[0].mxu0 %vm667_vm1, %v1379_v39 }
 0x4da   : > { %2092 = vmatprep.mubr.msk.f32.mxu0 %vm2257_vm2, %v2258_v25 }
 0x541   : > { %v1548_v41 = vpop.f32.mrb[0].mxu1 }
 0x542   : > { %v1549_v26 = vadd.f32 %v1918_v40, %v1548_v41  ;;  %v2064_v42 = vpop.f32.mrb[1].mxu1 }
 0x544   : > { %1560 = vrot.lane.b32.xlu0 %v1549_v26, %s2271_s30 }
 0x548   : > { %1576 = vrot.lane.b32.xlu0 %v1375_v12, %s2270_s2 }
 0x5ac   : > { %v1464_v43 = vpop.f32.mrb[0].mxu0 }
 0x5ad   : > { %v1465_v44 = vadd.f32 %v1916_v57, %v1464_v43  ;;  %v2053_v45 = vpop.f32.mrb[1].mxu0 }
 0x5af   : > { %v1552_v46 = vadd.f32 %v1549_v26, %v1465_v44 }
 0x5b1   : > { %v1920_v25 = vmul.f32 -1.442695, %v1552_v46 }
 0x5b3   : > { %2241 = vpow2.f32 %v1920_v25 }
 0x5b6   : > { %v1561_v50 = vpop.permute.xlu0 %1560 }
 0x5ba   : > { %v1577_v7 = vpop.permute.xlu0 %1576 }
 0x5bd   : > { %v2242_v47 = vpop.eup %2241 }
 0x5be   : > { %v1556_v48 = vadd.f32 1.0, %v2242_v47 }
 0x5c0   : > { %2243 = vrcp.f32 %v1556_v48 }
 0x5ca   : > { %v2244_v49 = vpop.eup %2243 }
 0x5cb   : > { %v1563_v51 = vmul.f32 %v2244_v49, %v1561_v50  ;;  %v1570_v10 = vsub.f32 1.0, %v2244_v49  ;;  %v1579_v15 = vmul.f32 %v2244_v49, %v1577_v7 }
 0x5cd   : > { %1565 = vrot.lane.b32.xlu1 %v1563_v51, %s2271_s30  ;;  %s2731_s30 = sld [smem:[#allocation10_spill]] }
 0x5d3   : > { %v1671_v61 = vld [vmem:[%s2731_s30] sm:$0xff]  ;;  %v1672_v62 = vld [vmem:[%s2731_s30 + $0x8] sm:$0xff]  ;;  %v1673_v63 = vld [vmem:[%s2731_s30 + $0x10] sm:$0xff] }
 0x5d4   : > { %v2158_v37 = vpack.c.bf16 %v1672_v62, %v1671_v61  ;;  %v1674_v0 = vld [vmem:[%s2731_s30 + $0x18] sm:$0xff]  ;;  %v1675_v2 = vld [vmem:[%s2731_s30 + $0x20] sm:$0xff]  ;;  %v1676_v3 = vld [vmem:[%s2731_s30 + $0x28] sm:$0xff] }
 0x5d5   : > { %v2161_v1 = vpack.c.bf16 %v1674_v0, %v1673_v63  ;;  %v2164_v11 = vpack.c.bf16 %v1676_v3, %v1675_v2  ;;  %v1677_v19 = vld [vmem:[%s2731_s30 + $0x30] sm:$0xff] }
 0x5d6   : > { %2159 = vmatpush3.bf16.msra.mxu0 %v2158_v37 }
 0x5d7   : > { %2160 = vmatprep.subr.bf16.mxu0 %v2256_v6 }
 0x5da   : > { %2162 = vmatpush3.bf16.msra.mxu0 %v2161_v1 }
 0x5db   : > { %2163 = vmatprep.subr.bf16.mxu0 %v2256_v6 }
 0x5de   : > { %2165 = vmatpush3.bf16.msra.mxu0 %v2164_v11 }
 0x5df   : > { %2166 = vmatprep.subr.bf16.mxu0 %v2256_v6  ;;  %v1678_v6 = vld [vmem:[%s2731_s30 + $0x38] sm:$0xff] }
 0x5e0   : > { %v2167_v4 = vpack.c.bf16 %v1678_v6, %v1677_v19 }
 0x5e2   : > { %2168 = vmatpush3.bf16.msra.mxu0 %v2167_v4 }
 0x63f   : > { %v1566_v52 = vpop.permute.xlu1 %1565 }
 0x640   : > { %v1568_v53 = vadd.f32 %v1566_v52, %v1465_v44 }
 0x642   : > { %2245 = vtanh.f32 %v1568_v53 }
 0x64c   : > { %v2246_v60 = vpop.eup %2245 }
 0x64d   : > { %1572 = vrot.lane.b32.xlu1 %v2246_v60, %s2272_s28 }
 0x6bf   : > { %v1573_v13 = vpop.permute.xlu1 %1572 }
 0x6c0   : > { %v1575_v16 = vmul.f32 %v1573_v13, %v1570_v10 }
 0x6c2   : > { %v1580_v17 = vadd.f32 %v1579_v15, %v1575_v16 }
 0x6c4   : > { %1582 = vrot.lane.b32.xlu1 %v1580_v17, %s2272_s28 }
 0x736   : > { %v1583_v18 = vpop.permute.xlu1 %1582 }
 0x737   : > { %1585 = vst.msk [vmem:[#allocation2] sm:$0x3] %vm937_vm7, %v1583_v18  ;;  %1586 = vst.msk [vmem:[%s634_s14] sm:$0x3] %vm937_vm7, %v1583_v18  ;;  %2074 = vmatmul.mubr.msk.f32.vlgmr.msra.gmra.mrb[2].mxu1 %vm756_vm3, %v1583_v18 }
 0x80a   : > { %v1666_v8 = vpop.f32.mrb[2].mxu1 }
 0x80b   : > { %v1667_v9 = vadd.f32 %v1921_v5, %v1666_v8  ;;  %v2075_v14 = vpop.f32.mrb[3].mxu1 }
 0x80d   : > { %v1670_v20 = vmax.f32 %v1667_v9, 0.0 }
 0x80f   : > { %2093 = vmatmul.mubr.msk.f32.vlgmr.msra.gmra.mrb[2].mxu0 %vm667_vm1, %v1670_v20 }
 0x8e2   : > { %v1755_v22 = vpop.f32.mrb[2].mxu0 }
 0x8e3   : > { %v1756_v34 = vadd.f32 %v1923_v21, %v1755_v22  ;;  %v2094_v36 = vpop.f32.mrb[3].mxu0 }
 0x8e5   : > { %1759 = vst [vmem:[%s630_s0] sm:$0x3] %v1756_v34 }
 0x8e6 PF: > { %s2734_s29 = sld [smem:[#allocation4_spill]] }
 0x8ec   : > { %s30_s0 = sadd.s32 1, %s2734_s29  }
 0x8ed   : > { %p27_p10 = scmp.ge.s32.totalorder %s30_s0, 10  }
 0x8ef   :  { %29 = sbr.rel (!%p27_p10) target bundleno = 8 (0x8), region = 158 }

</bundles_post_ra>
